<compile_context>
chip_gen: v7x
topology: tpu7x:2x2x1
jax: 0.10.0
libtpu: 0.0.40
codegen_flags: <defaults>
</compile_context>

<pallas_src>
import jax
import jax.numpy as jnp
from jax.experimental import pallas as pl
from jax.experimental.pallas import tpu as pltpu


def _cdiv(a, b):
    return (a + b - 1) // b


def _round_up(a, b):
    return _cdiv(a, b) * b


def _vmem_capacity_bytes():
    """Best-effort physical VMEM query; conservative 64 MiB (v7x) fallback."""
    try:
        info = pltpu.get_tpu_info()
        cap = int(getattr(info, "vmem_capacity_bytes", 0) or 0)
        if cap > 0:
            return cap
    except Exception:
        pass
    return 64 * 1024 * 1024


# ---------------------------------------------------------------------------
# Kernel
# ---------------------------------------------------------------------------
def _baichuan_mlp_kernel(x_ref, wgu_ref, wd_ref, o_ref, acc_ref):
    """One (token-tile i, intermediate-tile j) grid step.

    x_ref:   (tm, H)       token tile (resident across j)
    wgu_ref: (H, 2*tn)     fused [gate | up] projection column tile j
    wd_ref:  (tn, H)       down-projection row tile j
    o_ref:   (tm, H)       output tile (resident across j; stored at j == last)
    acc_ref: (tm, H) f32   VMEM accumulator
    """
    j = pl.program_id(1)
    tn = wd_ref.shape[0]

    @pl.when(j == 0)
    def _():
        acc_ref[...] = jnp.zeros_like(acc_ref)

    x = x_ref[...]
    # Single wide MXU op for gate+up (one RHS staging, one weight DMA stream).
    gu = jnp.dot(x, wgu_ref[...], preferred_element_type=jnp.float32)  # (tm, 2tn)
    gate = gu[:, :tn]          # lane-aligned static slices (tn % 128 == 0)
    up = gu[:, tn:]
    # SiluAndMul in f32: sigmoid -> EUP slot, muls -> VPU; hidden under MXU work.
    h = gate * jax.nn.sigmoid(gate) * up
    # NOTE: on v7x the ideal is to keep the partial sum in the MXU result
    # buffer (MRB); the f32 VMEM accumulator below is the portable fallback
    # and its RMW traffic is hidden under the down-proj matmul at tn >= 256.
    acc_ref[...] += jnp.dot(h.astype(wd_ref.dtype), wd_ref[...],
                            preferred_element_type=jnp.float32)

    @pl.when(j == pl.num_programs(1) - 1)
    def _():
        o_ref[...] = acc_ref[...].astype(o_ref.dtype)


# ---------------------------------------------------------------------------
# One-time (model-load-time) weight re-layout
# ---------------------------------------------------------------------------
def prepare_baichuan_mlp_weights(w_gate_up, w_down, *, tn=None,
                                 vmem_cap_bytes=None):
    """Re-layout + zero-pad weights once at model load time.

    PyTorch layout: gate_up_proj.weight (2*I, H), down_proj.weight (H, I).

    The intermediate dim I is zero-padded to a multiple of the reduction tile
    tn (>= 128, lane aligned) so any I works with a wide MXU tile: padded
    gate/up columns give silu(0)*0 = 0 and the matching W_down rows are zero,
    so the result is unchanged.  Gate/up tiles are interleaved into one
    tile-major array (n_j, H, 2*tn) and W_down into (n_j, tn, H) so every
    per-step weight DMA is a single contiguous HBM chunk.
    """
    two_i, H = w_gate_up.shape
    inter = two_i // 2
    assert w_down.shape == (H, inter)

    if tn is None:
        cap = int(vmem_cap_bytes) if vmem_cap_bytes else _vmem_capacity_bytes()
        tn = 512 if cap >= (100 << 20) else 256     # v5e/v6e vs v7x default
    tn = max(128, (tn // 128) * 128)                # lane aligned
    tn = min(tn, _round_up(inter, 128))             # never larger than padded I
    i_pad = _round_up(inter, tn)
    n_j = i_pad // tn
    dtype = w_gate_up.dtype

    # (out, in) -> (in, out) transposes, zero-padded along the intermediate dim.
    w_gate_t = jnp.zeros((H, i_pad), dtype).at[:, :inter].set(
        jnp.transpose(w_gate_up[:inter]))
    w_up_t = jnp.zeros((H, i_pad), dtype).at[:, :inter].set(
        jnp.transpose(w_gate_up[inter:]))
    w_down_t = jnp.zeros((i_pad, H), dtype).at[:inter, :].set(
        jnp.transpose(w_down))

    # Tile-major fused gate/up: tile j holds [gate_j | up_j] contiguously.
    wg3 = w_gate_t.reshape(H, n_j, tn).transpose(1, 0, 2)   # (n_j, H, tn)
    wu3 = w_up_t.reshape(H, n_j, tn).transpose(1, 0, 2)     # (n_j, H, tn)
    w_gu = jnp.concatenate([wg3, wu3], axis=-1)             # (n_j, H, 2*tn)
    w_dn = w_down_t.reshape(n_j, tn, H)                     # (n_j, tn, H)
    return {"w_gu": w_gu, "w_dn": w_dn, "tn": tn,
            "inter": inter, "inter_pad": i_pad}


# ---------------------------------------------------------------------------
# Tile planning
# ---------------------------------------------------------------------------
def _tile_vmem_bytes(tm, tn, H, x_bytes, w_bytes):
    io = 2 * 2 * tm * H * x_bytes               # x + out tiles, double-buffered
    wt = 2 * 3 * tn * H * w_bytes               # fused gate/up (2tn) + down (tn), 2-buf
    acc = tm * H * 4                            # resident f32 accumulator
    tmp = 4 * tm * tn * 4 + tm * tn * w_bytes   # f32 gu/gate/up/h temps + cast of h
    return io + wt + acc + tmp


def _pick_token_tile(T, tm_req, x_dtype, H, tn, w_bytes, vmem_cap):
    x_bytes = jnp.dtype(x_dtype).itemsize
    align = 16 if x_bytes < 4 else 8            # bf16 packs 16 sublanes per vreg
    budget = max(vmem_cap - (8 << 20), 8 << 20)  # leave Mosaic internal headroom

    if tm_req is None:
        # Generation-aware default: 128 MiB parts (v5e/v6e) -> tm=1024 (prefill
        # becomes MXU-bound); 64 MiB parts (v7x) -> tm=512.
        tm = 1024 if vmem_cap >= (100 << 20) else 512
    else:
        tm = max(align, (tm_req // align) * align)

    if tm >= T:
        tm = T                                   # single full-extent token block
    elif T < 2 * tm:
        # Balance the two token tiles so both v7x megacore TCs stay busy.
        tm = min(tm, _round_up(_cdiv(T, 2), align))

    # Shrink until the tile plan fits VMEM (includes f32 temporaries).
    while tm > align and _tile_vmem_bytes(tm, tn, H, x_bytes, w_bytes) > budget:
        tm = _round_up(_cdiv(tm, 2), align)
    return tm


# ---------------------------------------------------------------------------
# Wrapper
# ---------------------------------------------------------------------------
def baichuan_mlp(x, mlp_weights, *, tm=None, vmem_cap_bytes=None):
    """x: (T, H). mlp_weights: output of prepare_baichuan_mlp_weights()."""
    w_gu, w_dn, tn = mlp_weights["w_gu"], mlp_weights["w_dn"], mlp_weights["tn"]
    n_j, H, two_tn = w_gu.shape
    assert two_tn == 2 * tn and w_dn.shape == (n_j, tn, H)
    T, Hx = x.shape
    assert Hx == H
    i_pad = n_j * tn

    x_bytes = jnp.dtype(x.dtype).itemsize
    w_bytes = jnp.dtype(w_gu.dtype).itemsize
    vmem_cap = int(vmem_cap_bytes) if vmem_cap_bytes else _vmem_capacity_bytes()
    tm = _pick_token_tile(T, tm, x.dtype, H, tn, w_bytes, vmem_cap)
    n_i = _cdiv(T, tm)
    grid = (n_i, n_j)

    need = _tile_vmem_bytes(tm, tn, H, x_bytes, w_bytes) + (8 << 20)
    vmem_limit = int(min(vmem_cap - (2 << 20), max(need, 16 << 20)))

    cost = pl.CostEstimate(
        flops=6 * T * H * i_pad,                       # 2*T*H*2I + 2*T*I*H
        transcendentals=T * i_pad,                     # sigmoid
        bytes_accessed=(2 * T * H * x_bytes            # x read + out write
                        + n_i * 3 * H * i_pad * w_bytes),  # weights per token tile
    )

    return pl.pallas_call(
        _baichuan_mlp_kernel,
        out_shape=jax.ShapeDtypeStruct((T, H), x.dtype),
        grid_spec=pltpu.PrefetchScalarGridSpec(
            num_scalar_prefetch=0,
            grid=grid,
            in_specs=[
                pl.BlockSpec((tm, H), lambda i, j: (i, 0)),               # x
                pl.BlockSpec((None, H, 2 * tn), lambda i, j: (j, 0, 0)),  # [gate|up] tile j
                pl.BlockSpec((None, tn, H), lambda i, j: (j, 0, 0)),      # down tile j
            ],
            out_specs=pl.BlockSpec((tm, H), lambda i, j: (i, 0)),
            scratch_shapes=[pltpu.VMEM((tm, H), jnp.float32)],
        ),
        compiler_params=pltpu.CompilerParams(
            dimension_semantics=("parallel", "arbitrary"),
            vmem_limit_bytes=vmem_limit),
        cost_estimate=cost,
    )(x, w_gu, w_dn)


def reference_mlp(x, w_gate_up, w_down):
    gate_up = x @ w_gate_up.T
    inter = w_gate_up.shape[0] // 2
    gate, up = gate_up[:, :inter], gate_up[:, inter:]
    return (jax.nn.silu(gate) * up) @ w_down.T


if __name__ == "__main__":
    # Force full-precision f32 matmuls for a tight self-test (deployments feed
    # bf16 activations/weights; the in-kernel cast of h to the weight dtype
    # matches the PyTorch module, use a looser ~2e-2 tolerance for bf16 runs).
    jax.config.update("jax_default_matmul_precision", "highest")

    # Small synthetic configuration (deterministic init, no checkpoint).
    num_tokens = 16
    hidden_size = 128
    intermediate_size = 200   # deliberately NOT a multiple of 128: exercises zero-padding

    key = jax.random.PRNGKey(0)
    kx, kgu, kd = jax.random.split(key, 3)

    x = jax.random.normal(kx, (num_tokens, hidden_size), dtype=jnp.float32)
    # PyTorch nn.Linear weight layout: (out_features, in_features)
    w_gate_up = jax.random.normal(
        kgu, (2 * intermediate_size, hidden_size), dtype=jnp.float32) * 0.05
    w_down = jax.random.normal(
        kd, (hidden_size, intermediate_size), dtype=jnp.float32) * 0.05

    ref = reference_mlp(x, w_gate_up, w_down)

    # Multi-tile path: tn=128 -> I padded 200 -> 256 (2 reduction tiles, the
    # second containing zero-padded columns/rows), tm=8 -> 2 token tiles.
    # Exercises accumulator init / accumulate / writeback and padding.
    w_small = prepare_baichuan_mlp_weights(w_gate_up, w_down, tn=128)
    out_tiled = jax.block_until_ready(baichuan_mlp(x, w_small, tm=8))

    # Default plan (generation-aware tm / VMEM; collapses to one block here).
    w_default = prepare_baichuan_mlp_weights(w_gate_up, w_down)
    out_default = jax.block_until_ready(baichuan_mlp(x, w_default))

    assert out_tiled.shape == (num_tokens, hidden_size)
    # Tolerance covers MXU pass / accumulation-order differences vs the XLA
    # reference; real bugs (missing tiles, wrong padding) are O(0.1) off.
    assert jnp.allclose(out_tiled, ref, atol=5e-3, rtol=5e-3), "tiled mismatch"
    assert jnp.allclose(out_default, ref, atol=5e-3, rtol=5e-3), "default mismatch"

    print("KERNEL_OK")
</pallas_src>

<mosaic_0001>
module attributes {stable_mosaic.version = 11 : i64} {
  func.func @_baichuan_mlp_kernel(%arg0: i32, %arg1: i32, %arg2: memref<8x128xf32, #tpu.memory_space<vmem>>, %arg3: memref<1x128x256xf32, #tpu.memory_space<vmem>>, %arg4: memref<1x128x128xf32, #tpu.memory_space<vmem>>, %arg5: memref<8x128xf32, #tpu.memory_space<vmem>>, %arg6: memref<8x128xf32, #tpu.memory_space<vmem>>) attributes {dimension_semantics = [#tpu.dimension_semantics<parallel>, #tpu.dimension_semantics<arbitrary>], iteration_bounds = array<i64: 2, 2>, scalar_prefetch = 0 : i64, scratch_operands = 1 : i64, tpu.core_type = #tpu.core_type<tc>, window_params = [{transform_indices = @transform_0, window_bounds = array<i64: 8, 128>}, {transform_indices = @transform_1, window_bounds = array<i64: 1, 128, 256>}, {transform_indices = @transform_2, window_bounds = array<i64: 1, 128, 128>}, {transform_indices = @transform_3, window_bounds = array<i64: 8, 128>}]} {
    %c0_i32 = arith.constant 0 : i32
    %0 = arith.cmpi eq, %arg1, %c0_i32 : i32
    %1 = arith.extui %0 : i1 to i32
    %c0_i32_0 = arith.constant 0 : i32
    %2 = arith.cmpi ne, %1, %c0_i32_0 : i32
    scf.if %2 {
      %cst_15 = arith.constant 0.000000e+00 : f32
      %25 = vector.broadcast %cst_15 : f32 to vector<8x128xf32>
      %c0_16 = arith.constant 0 : index
      %c0_17 = arith.constant 0 : index
      %26 = vector.load %arg6[%c0_16, %c0_17] : memref<8x128xf32, #tpu.memory_space<vmem>>, vector<8x128xf32>
      tpu.vector_store %arg6[%c0_16, %c0_17], %25 {strides = array<i32>} : memref<8x128xf32, #tpu.memory_space<vmem>>, vector<8x128xf32>,
    } else {
    }
    %c0 = arith.constant 0 : index
    %c0_1 = arith.constant 0 : index
    %3 = vector.load %arg2[%c0, %c0_1] : memref<8x128xf32, #tpu.memory_space<vmem>>, vector<8x128xf32>
    %c0_2 = arith.constant 0 : index
    %c0_3 = arith.constant 0 : index
    %c0_4 = arith.constant 0 : index
    %4 = vector.load %arg3[%c0_2, %c0_3, %c0_4] : memref<1x128x256xf32, #tpu.memory_space<vmem>>, vector<1x128x256xf32>
    %5 = vector.shape_cast %4 : vector<1x128x256xf32> to vector<128x256xf32>
    %cst = arith.constant dense<0.000000e+00> : vector<8x256xf32>
    %6 = tpu.matmul %3, %5, %cst {dimension_numbers = #tpu.dot_dimension_numbers<[1], [0], [0], [1], [0, 0, 1, 1], [], []>, precision = #tpu.contract_precision<fp32>} : vector<8x128xf32>, vector<128x256xf32>, vector<8x256xf32> -> vector<8x256xf32>
    %7 = vector.extract_strided_slice %6 {offsets = [0, 0], sizes = [8, 128], strides = [1, 1]} : vector<8x256xf32> to vector<8x128xf32>
    %8 = vector.extract_strided_slice %6 {offsets = [0, 128], sizes = [8, 128], strides = [1, 1]} : vector<8x256xf32> to vector<8x128xf32>
    %9 = arith.negf %7 : vector<8x128xf32>
    %10 = math.exp %9 : vector<8x128xf32>
    %cst_5 = arith.constant 1.000000e+00 : f32
    %11 = vector.broadcast %cst_5 : f32 to vector<8x128xf32>
    %12 = arith.addf %11, %10 : vector<8x128xf32>
    %13 = arith.divf %11, %12 : vector<8x128xf32>
    %14 = arith.mulf %7, %13 : vector<8x128xf32>
    %15 = arith.mulf %14, %8 : vector<8x128xf32>
    %c0_6 = arith.constant 0 : index
    %c0_7 = arith.constant 0 : index
    %16 = vector.load %arg6[%c0_6, %c0_7] : memref<8x128xf32, #tpu.memory_space<vmem>>, vector<8x128xf32>
    %c0_8 = arith.constant 0 : index
    %c0_9 = arith.constant 0 : index
    %c0_10 = arith.constant 0 : index
    %17 = vector.load %arg4[%c0_8, %c0_9, %c0_10] : memref<1x128x128xf32, #tpu.memory_space<vmem>>, vector<1x128x128xf32>
    %18 = vector.shape_cast %17 : vector<1x128x128xf32> to vector<128x128xf32>
    %cst_11 = arith.constant dense<0.000000e+00> : vector<8x128xf32>
    %19 = tpu.matmul %15, %18, %cst_11 {dimension_numbers = #tpu.dot_dimension_numbers<[1], [0], [0], [1], [0, 0, 1, 1], [], []>, precision = #tpu.contract_precision<fp32>} : vector<8x128xf32>, vector<128x128xf32>, vector<8x128xf32> -> vector<8x128xf32>
    %20 = arith.addf %16, %19 : vector<8x128xf32>
    %c0_12 = arith.constant 0 : index
    %c0_13 = arith.constant 0 : index
    %21 = vector.load %arg6[%c0_12, %c0_13] : memref<8x128xf32, #tpu.memory_space<vmem>>, vector<8x128xf32>
    tpu.vector_store %arg6[%c0_12, %c0_13], %20 {strides = array<i32>} : memref<8x128xf32, #tpu.memory_space<vmem>>, vector<8x128xf32>,
    %c1_i32 = arith.constant 1 : i32
    %22 = arith.cmpi eq, %arg1, %c1_i32 : i32
    %23 = arith.extui %22 : i1 to i32
    %c0_i32_14 = arith.constant 0 : i32
    %24 = arith.cmpi ne, %23, %c0_i32_14 : i32
    scf.if %24 {
      %c0_15 = arith.constant 0 : index
      %c0_16 = arith.constant 0 : index
      %25 = vector.load %arg6[%c0_15, %c0_16] : memref<8x128xf32, #tpu.memory_space<vmem>>, vector<8x128xf32>
      %c0_17 = arith.constant 0 : index
      %c0_18 = arith.constant 0 : index
      %26 = vector.load %arg5[%c0_17, %c0_18] : memref<8x128xf32, #tpu.memory_space<vmem>>, vector<8x128xf32>
      tpu.vector_store %arg5[%c0_17, %c0_18], %25 {strides = array<i32>} : memref<8x128xf32, #tpu.memory_space<vmem>>, vector<8x128xf32>,
    } else {
    }
    return
  }
  func.func @transform_0(%arg0: i32, %arg1: i32) -> (i32, i32) {
    %c0_i32 = arith.constant 0 : i32
    %c0_i32_0 = arith.constant 0 : i32
    return %arg0, %c0_i32 : i32, i32
  }
  func.func @transform_1(%arg0: i32, %arg1: i32) -> (i32, i32, i32) {
    %c0_i32 = arith.constant 0 : i32
    %c0_i32_0 = arith.constant 0 : i32
    %c0_i32_1 = arith.constant 0 : i32
    return %arg1, %c0_i32, %c0_i32_0 : i32, i32, i32
  }
  func.func @transform_2(%arg0: i32, %arg1: i32) -> (i32, i32, i32) {
    %c0_i32 = arith.constant 0 : i32
    %c0_i32_0 = arith.constant 0 : i32
    %c0_i32_1 = arith.constant 0 : i32
    return %arg1, %c0_i32, %c0_i32_0 : i32, i32, i32
  }
  func.func @transform_3(%arg0: i32, %arg1: i32) -> (i32, i32) {
    %c0_i32 = arith.constant 0 : i32
    %c0_i32_0 = arith.constant 0 : i32
    return %arg0, %c0_i32 : i32, i32
  }
}

</mosaic_0001>

<bundles_post_ra>
// kernel: tpu_custom_call.1
= control target key start
LH: loop header
LB: loop body
LE: loop exit
PB: predicated region body
PF: predicated region fallthrough
CT: control target
= control target key end

     0   :  { %s4117_s0 = inlined_call_operand.hbm [shape: f32[16,128], index: 0, kind: input, shape index: {}]   ;;  %s4118_s1 = inlined_call_operand.hbm [shape: f32[2,128,256], index: 1, kind: input, shape index: {}]   ;;  %s4119_s2 = inlined_call_operand.hbm [shape: f32[2,128,128], index: 2, kind: input, shape index: {}]   ;;  %s4120_s3 = inlined_call_operand.hbm [shape: f32[16,128], index: 3, kind: output, shape index: {}]  }
   0x1   :  { %4199 = sst [smem:[#allocation43_spill]] %s4118_s1 }
   0x2   :  { %4200 = sst [smem:[#allocation44_spill]] %s4120_s3 }
   0x3   :  { %8 = vsyncpa [#allocation4], 0 }
   0x4   :  { %10 = vsyncpa [#allocation4 + $0x1], 0 }
   0x5   :  { %11 = vsyncpa [#allocation7], 0 }
   0x6   :  { %13 = vsyncpa [#allocation7 + $0x1], 0 }
   0x7   :  { %14 = vsyncpa [#allocation5], 0 }
   0x8   :  { %16 = vsyncpa [#allocation5 + $0x1], 0  ;;  %s3038_s12 = smov 0   ;;  %s3040_s13 = smov 0  }
   0x9   :  { %s3042_s14 = smov 0   ;;  %s3044_s15 = smov 0  }
   0xa   :  { %s3046_s16 = smov 0   ;;  %s3048_s17 = smov 0  }
   0xb   :  { %s3050_s18 = smov 0   ;;  %s3052_s19 = smov 0  }
   0xc   :  { %s3054_s20 = smov 0   ;;  %s3056_s21 = smov 0  }
   0xd   :  { %s3058_s22 = smov 0  }
   0xe LB: > { %4201 = sst [smem:[#allocation13_spill]] %s2972_s14  ;;  %s31_s23 = sadd.s32 1, %s2996_s20  ;;  %s3004_s22 = sphi %s3058_s22, %s22_s22   ;;  %s3000_s21 = sphi %s3056_s21, %s4321_s21   ;;  %s2996_s20 = sphi %s3054_s20, %s4327_s20   ;;  %s2992_s19 = sphi %s3052_s19, %s4319_s19   ;;  %s2988_s18 = sphi %s3050_s18, %s4326_s18   ;;  %s2984_s17 = sphi %s3048_s17, %s4318_s17   ;;  %s2980_s16 = sphi %s3046_s16, %s4325_s16   ;;  %s2976_s15 = sphi %s3044_s15, %s4324_s15   ;;  %s2972_s14 = sphi %s3042_s14, %s4316_s14   ;;  %s2968_s13 = sphi %s3040_s13, %s4323_s13   ;;  %s2964_s12 = sphi %s3038_s12, %s4322_s12  }
   0xf   : > { %4202 = sst [smem:[#allocation14_spill]] %s2984_s17  ;;  %p49_p0 = scmp.eq.s32.totalorder %s3004_s22, 0 }
  0x10   : > { %4203 = sst [smem:[#allocation15_spill]] %s2992_s19  ;;  %s67_s24 = sadd.s32 1, %s2972_s14 }
  0x11   : > { %4204 = sst [smem:[#allocation16_spill]] %s3000_s21  ;;  %p74_p1 = scmp.ne.s32.totalorder %s2972_s14, %s2968_s13 }
  0x12   : > { %p4121_p4 = scmp.lt.s32.totalorder %s3004_s22, 4  ;;  %s174_s25 = sand.u32 1, %s3004_s22  }
  0x13   : > { %p76_p3 = por %p74_p1, %p49_p0  ;;  %s176_s26 = sand.u32 1, %s2972_s14  }
  0x14   : > { %s1986_s27 = sshll.u32 %s176_s26, 8  ;;  %s2004_s28 = sshll.u32 %s2996_s20, 12 }
  0x15   : > { %s4205_s1 = sld [smem:[#allocation43_spill]]  ;;  %s178_s5 = scalar_lea.vmem [#allocation6], %s1986_s27 }
  0x16   : > { %s185_s6 = sshll.u32 %s178_s5, 4  ;;  %p3115_p5 = pnand %p4121_p4, %p76_p3  ;;  %s3111_s6 = int_to_ptr.vmem [resolvable:$true] %s185_s6 }
  0x17   : > { %s3119_s8 = sshll.u32 %s176_s26, 7  ;;  %s3121_s9 = scalar_lea.sflag [#allocation7], %s174_s25 }
  0x18   : > { %p4123_p7 = pneg %p3115_p5 }
  0x1b   : > { %s3109_s4 = scalar_lea.hbm %s4205_s1, %s2004_s28  ;;  %s2793_s28 = scalar_lea.hbm %s4205_s1, 8192 }
  0x1c   : > { %s2788_s10 = scalar_lea.hbm %s3109_s4, 4096  ;;  %p2794_p10 = scmp.lt.u32.totalorder %s3109_s4, %s4205_s1 }
  0x1d   : > { %p2789_p6 = scmp.ne.s32.totalorder %s3109_s4, %s2788_s10  ;;  %p2795_p11 = scmp.lt.u32.totalorder %s2793_s28, %s2788_s10 }
  0x1e   : > { %p2797_p13 = scmp.lt.u32.totalorder %s2788_s10, %s3109_s4 }
  0x1f   : > { %p2791_p8 = pnand %p4123_p7, %p2789_p6  ;;  %p2796_p12 = por %p2795_p11, %p2794_p10 }
  0x21   : > { %p2792_p9 = pneg %p2791_p8  ;;  %p2798_p1 = por %p2797_p13, %p2796_p12 }
  0x23   : > { %p2799_p3 = pnand %p2798_p1, %p2792_p9 }
  0x25   : > { %2802 = shalt.err (!%p2799_p3)
}
  0x26   : > { %s2803_s25 = scalar_lea.vmem %s3111_s6, 4096  ;;  %s3006_s26 = smov [#allocation6]  }
  0x27   : > { %p2804_p6 = scmp.ne.s32.totalorder %s3111_s6, %s2803_s25  ;;  %s2808_s5 = sshll.u32 %s3006_s26, 4  ;;  %s2809_s5 = int_to_ptr.vmem [resolvable:$false] %s2808_s5 }
  0x28   : > { %s2810_s11 = scalar_lea.vmem %s2809_s5, 8192  ;;  %p2811_p2 = scmp.lt.s32.totalorder %s3111_s6, %s2809_s5 }
  0x29   : > { %p2806_p8 = pnand %p2804_p6, %p4123_p7  ;;  %p2812_p10 = scmp.lt.s32.totalorder %s2810_s11, %s2803_s25 }
  0x2b   : > { %p2807_p4 = pneg %p2806_p8  ;;  %p2813_p11 = por %p2812_p10, %p2811_p2 }
  0x2d   : > { %p2814_p12 = pnand %p2813_p11, %p2807_p4 }
  0x2f   : > { %2817 = shalt.err (!%p2814_p12)
}
  0x30   : > { %s3007_s10 = smov 256   ;;  %s3008_s27 = smov 16  }
  0x31   : > { %2678 = dma.hbm_to_vmem [thread:$0]  (!%p3115_p5), %s3109_s4, 4096, %s3111_s6, %s3121_s9, %s3007_s10, %s3007_s10, %s3008_s27  }
  0x32   : > { %p1992_p2 = scmp.ge.s32.totalorder %s3004_s22, 1  ;;  %s199_s28 = scalar_lea.vmem [#allocation8], %s3119_s8 }
  0x33   : > { %s3151_s29 = sshll.u32 %s199_s28, 4  ;;  %p214_p4 = scmp.lt.s32.totalorder %s3004_s22, 5  ;;  %s3279_s29 = int_to_ptr.vmem [resolvable:$true] %s3151_s29 }
  0x34   : > { %s3159_s25 = sadd.s32 4294967295, %s3004_s22   ;;  %s1981_s4 = sadd.s32 4294967294, %s3004_s22  }
  0x35   : > { %p3154_p9 = pnand %p1992_p2, %p214_p4  ;;  %p32_p13 = scmp.ge.s32.totalorder %s31_s23, 2 }
  0x36   : > { %s34_s6 = sadd.s32 1, %s3000_s21  ;;  %s41_s8 = sadd.s32 1, %s2984_s17 }
  0x37   : > { %s4207_s30 = scalar_select %p3154_p9, 1, 0 }
  0x38   : > { %s4329_s23 = smov (%p32_p13, %s31_s23), 0  ;;  %s4331_s6 = smov (!%p32_p13, %s34_s6), %s3000_s21 }
  0x39   : > { %4208 = sst [smem:[#allocation17_spill]] %s4329_s23  ;;  %p48_p1 = scmp.ne.s32.totalorder %s2984_s17, %s2980_s16 }
  0x3a   : > { %p54_p3 = scmp.ne.s32.totalorder %s2980_s16, %s2976_s15  ;;  %p36_p6 = scmp.ge.s32.totalorder %s4331_s6, 2 }
  0x3b   : > { %p55_p8 = scmp.eq.s32.totalorder %s3159_s25, 0  ;;  %p3181_p10 = por %p49_p0, %p48_p1 }
  0x3c   : > { %s64_s5 = ssub.s32 %s2996_s20, %s4329_s23  ;;  %s4333_s6 = smov (%p36_p6, %s4331_s6), 0 }
  0x3d   : > { %4210 = sst [smem:[#allocation18_spill]] %s4333_s6  ;;  %p3192_p11 = por %p55_p8, %p54_p3 }
  0x3e   : > { %p65_p12 = scmp.eq.s32.totalorder %s64_s5, 0  ;;  %s38_s10 = ssub.s32 %s3000_s21, %s4333_s6 }
  0x3f   : > { %s4211_s11 = scalar_select %p3192_p11, 1, 0 }
  0x40   : > { %p4212_p2 = scmp.ne.s32.totalorder %s2968_s13, %s2964_s12  ;;  %p39_p0 = scmp.eq.s32.totalorder %s38_s10, 0 }
  0x41   : > { %p130_p13 = scmp.eq.s32.totalorder %s3159_s25, 3  ;;  %p136_p7 = scmp.eq.s32.totalorder %s1981_s4, 3 }
  0x42   : > { %p3201_p4 = por %p4212_p2, %p55_p8  ;;  %s156_s5 = sand.u32 1, %s2984_s17  }
  0x43   : > { %s3209_s28 = scalar_select %p65_p12, %s2972_s14, %s67_s24  }
  0x44   : > { %s4213_s27 = scalar_select %p3201_p4, 1, 0 }
  0x45   : > { %4214 = sst [smem:[#allocation19_spill]] %s3209_s28  ;;  %p3217_p6 = por %p130_p13, %p48_p1 }
  0x46   : > { %s3212_s1 = scalar_select %p39_p0, %s2984_s17, %s41_s8  }
  0x47   : > { %s4216_s23 = scalar_select %p3217_p6, 1, 0 }
  0x48   : > { %4215 = sst [smem:[#allocation20_spill]] %s3212_s1  ;;  %s1985_s12 = sshll.u32 %s3000_s21, 7 }
  0x49   : > { %p3226_p8 = por %p136_p7, %p54_p3  ;;  %s1984_s10 = sshll.u32 %s156_s5, 3 }
  0x4a   : > { %s3233_s24 = scalar_lea.hbm %s4117_s0, %s1985_s12  ;;  %p4218_p12 = scmp.lt.s32.totalorder %s3004_s22, 4 }
  0x4b   : > { %s4217_s6 = scalar_select %p3226_p8, 1, 0 }
  0x4c   : > { %p3239_p1 = pnand %p4218_p12, %p3181_p10  ;;  %s160_s8 = scalar_lea.vmem [#allocation3], %s1984_s10 }
  0x4d   : > { %s167_s21 = sshll.u32 %s160_s8, 4  ;;  %s2005_s1 = sshll.u32 %s2996_s20, 11  ;;  %s3244_s21 = int_to_ptr.vmem [resolvable:$true] %s167_s21 }
  0x4e   : > { %s157_s3 = scalar_lea.sflag [#allocation4], %s156_s5  ;;  %s2818_s19 = scalar_lea.hbm %s3233_s24, 128 }
  0x4f   : > { %p2819_p7 = scmp.ne.s32.totalorder %s3233_s24, %s2818_s19  ;;  %p2820_p3 = pneg %p3239_p1 }
  0x50   : > { %s2823_s17 = scalar_lea.hbm %s4117_s0, 256  ;;  %p2824_p10 = scmp.lt.u32.totalorder %s3233_s24, %s4117_s0 }
  0x51   : > { %p2821_p2 = pnand %p2820_p3, %p2819_p7  ;;  %p2825_p13 = scmp.lt.u32.totalorder %s2823_s17, %s2818_s19 }
  0x52   : > { %p2827_p8 = scmp.lt.u32.totalorder %s2818_s19, %s3233_s24 }
  0x53   : > { %p2822_p0 = pneg %p2821_p2  ;;  %p2826_p12 = por %p2825_p13, %p2824_p10 }
  0x55   : > { %p2828_p6 = por %p2827_p8, %p2826_p12 }
  0x57   : > { %p2829_p4 = pnand %p2828_p6, %p2822_p0 }
  0x59   : > { %2832 = shalt.err (!%p2829_p4)
}
  0x5a   : > { %s2833_s5 = scalar_lea.vmem %s3244_s21, 128  ;;  %s3009_s10 = smov [#allocation3]  }
  0x5b   : > { %p2834_p7 = scmp.ne.s32.totalorder %s3244_s21, %s2833_s5  ;;  %s2838_s8 = sshll.u32 %s3009_s10, 4  ;;  %s2839_s8 = int_to_ptr.vmem [resolvable:$false] %s2838_s8 }
  0x5c   : > { %s2840_s14 = scalar_lea.vmem %s2839_s8, 256  ;;  %p2841_p9 = scmp.lt.s32.totalorder %s3244_s21, %s2839_s8 }
  0x5d   : > { %p2836_p2 = pnand %p2834_p7, %p2820_p3  ;;  %p2842_p10 = scmp.lt.s32.totalorder %s2840_s14, %s2833_s5 }
  0x5f   : > { %p2837_p11 = pneg %p2836_p2  ;;  %p2843_p13 = por %p2842_p10, %p2841_p9 }
  0x61   : > { %p2844_p8 = pnand %p2843_p13, %p2837_p11 }
  0x63   : > { %2847 = shalt.err (!%p2844_p8)
}
  0x64   : > { %2675 = dma.hbm_to_vmem [thread:$0]  (!%p3239_p1), %s3233_s24, 128, %s3244_s21, %s157_s3  }
  0x65   : > { %s3276_s19 = scalar_lea.hbm %s4119_s2, %s2005_s1  ;;  %p4220_p11 = pneg %p3115_p5 }
  0x66   : > { %s2848_s26 = scalar_lea.hbm %s3276_s19, 2048  ;;  %s2853_s24 = scalar_lea.hbm %s4119_s2, 4096 }
  0x67   : > { %p2849_p9 = scmp.ne.s32.totalorder %s3276_s19, %s2848_s26  ;;  %p2854_p1 = scmp.lt.u32.totalorder %s3276_s19, %s4119_s2 }
  0x68   : > { %p2855_p3 = scmp.lt.u32.totalorder %s2853_s24, %s2848_s26  ;;  %p2857_p12 = scmp.lt.u32.totalorder %s2848_s26, %s3276_s19 }
  0x69   : > { %p2851_p4 = pnand %p2849_p9, %p4220_p11 }
  0x6a   : > { %p2856_p0 = por %p2855_p3, %p2854_p1 }
  0x6b   : > { %p2852_p6 = pneg %p2851_p4 }
  0x6c   : > { %p2858_p7 = por %p2857_p12, %p2856_p0 }
  0x6e   : > { %p2859_p2 = pnand %p2858_p7, %p2852_p6 }
  0x70   : > { %2862 = shalt.err (!%p2859_p2)
}
  0x71   : > { %s2863_s1 = scalar_lea.vmem %s3279_s29, 2048  ;;  %p4221_p13 = pmov %p4220_p11 }
  0x72   : > { %p2864_p10 = scmp.ne.s32.totalorder %s3279_s29, %s2863_s1  ;;  %s3010_s5 = smov [#allocation8]  }
  0x73   : > { %s2868_s10 = sshll.u32 %s3010_s5, 4  ;;  %s2869_s10 = int_to_ptr.vmem [resolvable:$false] %s2868_s10 }
  0x74   : > { %p2866_p8 = pnand %p2864_p10, %p4221_p13  ;;  %s2870_s8 = scalar_lea.vmem %s2869_s10, 4096 }
  0x75   : > { %p2871_p11 = scmp.lt.s32.totalorder %s3279_s29, %s2869_s10  ;;  %p2872_p4 = scmp.lt.s32.totalorder %s2870_s8, %s2863_s1 }
  0x76   : > { %p2867_p9 = pneg %p2866_p8 }
  0x77   : > { %p2873_p1 = por %p2872_p4, %p2871_p11 }
  0x79   : > { %p2874_p3 = pnand %p2873_p1, %p2867_p9 }
  0x7b   : > { %2877 = shalt.err (!%p2874_p3)
}
  0x7c   : > { %s3011_s14 = smov 128   ;;  %s3012_s17 = smov 8  }
  0x7d   : > { %2681 = dma.hbm_to_vmem [thread:$0]  (!%p3115_p5), %s3276_s19, 2048, %s3279_s29, %s3121_s9, %s3011_s14, %s3011_s14, %s3012_s17  }
  0x7e   : > { %p4222_p6 = scmp.ne.s32.totalorder %s4207_s30, 0 }
  0x80   : > { %218 = sbr.rel (%p4222_p6) target bundleno = 1015 (0x3f7), region = 32 }
  0x87   : > { %s3308_s28 = sand.u32 1, %s2980_s16   ;;  %p4223_p0 = scmp.ne.s32.totalorder %s4211_s11, 0 }
  0x88   : > { %s1993_s26 = sshll.u32 %s3308_s28, 3  ;;  %s221_s4 = scalar_lea.sflag [#allocation4], %s3308_s28 }
  0x89   : > { %s3312_s21 = scalar_lea.vmem [#allocation3], %s1993_s26 }
  0x8a   : > { %2951 = dma.done.wait (%p4223_p0), %s221_s4, 128  }
  0x8b   : > { %2953 = vsyncadd (%p4223_p0), %s221_s4, 4294967168  ;;  %s229_s7 = sand.u32 1, %s3159_s25   ;;  %s231_s9 = sand.u32 1, %s2968_s13  }
  0x8c   : > { %s1994_s29 = sshll.u32 %s231_s9, 8  ;;  %s230_s30 = scalar_lea.sflag [#allocation7], %s229_s7 }
  0x8d   : > { %s3320_s19 = scalar_lea.vmem [#allocation6], %s1994_s29  ;;  %p4224_p5 = scmp.ne.s32.totalorder %s4213_s27, 0 }
  0x8f   : > { %2955 = dma.done.wait (%p4224_p5), %s230_s30, 6144  }
  0x90   : > { %2957 = vsyncadd (%p4224_p5), %s230_s30, 4294961152  ;;  %s1995_s24 = sshll.u32 %s231_s9, 7  ;;  %s3328_s12 = scalar_lea.vmem [#allocation9], %s1993_s26 }
  0x91   : > { %s3326_s3 = scalar_lea.vmem [#allocation8], %s1995_s24  ;;  %p1997_p12 = scmp.ne.s32.totalorder %s2988_s18, 0 }
  0x92   : > { %v3013_v0 = vmov (!%p1997_p12), 0.0  }
  0x93   : > { %278 = sbr.rel (%p1997_p12) target bundleno = 154 (0x9a), region = 48  ;;  %279 = vst [vmem:[#allocation2] sm:$0xff] (!%p1997_p12), %v3013_v0 }
  0x9a PF: > { %v282_v1 = vld [vmem:[%s3320_s19 + $0x8] sm:$0xff]  ;;  %v284_v2 = vld [vmem:[%s3320_s19 + $0x18] sm:$0xff]  ;;  %v281_v3 = vld [vmem:[%s3320_s19] sm:$0xff]  ;;  %v4134_v10 = vmov 0.0   ;;  %vm3016_vm0 = vmmov 0   ;;  %p1999_p7 = scmp.ne.s32.totalorder %s2988_s18, 1 }
  0x9b   : > { %v313_v4 = vand.u32 4294901760, %v282_v1  ;;  %v317_v5 = vand.u32 4294901760, %v284_v2  ;;  %v283_v6 = vld [vmem:[%s3320_s19 + $0x10] sm:$0xff]  ;;  %v315_v7 = vand.u32 4294901760, %v281_v3  ;;  %v286_v8 = vld [vmem:[%s3320_s19 + $0x28] sm:$0xff]  ;;  %v288_v9 = vld [vmem:[%s3320_s19 + $0x38] sm:$0xff]  ;;  %409 = vmatprep.mubr.f32.mxu0 %v4134_v10 }
  0x9c   : > { %v319_v11 = vand.u32 4294901760, %v283_v6  ;;  %v321_v12 = vand.u32 4294901760, %v286_v8  ;;  %v325_v13 = vand.u32 4294901760, %v288_v9  ;;  %v285_v14 = vld [vmem:[%s3320_s19 + $0x20] sm:$0xff]  ;;  %v287_v15 = vld [vmem:[%s3320_s19 + $0x30] sm:$0xff]  ;;  %v290_v16 = vld [vmem:[%s3320_s19 + $0x48] sm:$0xff] }
  0x9d   : > { %v3341_v17 = vpack.c.bf16 %v317_v5, %v313_v4  ;;  %v292_v18 = vld [vmem:[%s3320_s19 + $0x58] sm:$0xff]  ;;  %v289_v19 = vld [vmem:[%s3320_s19 + $0x40] sm:$0xff]  ;;  %v291_v20 = vld [vmem:[%s3320_s19 + $0x50] sm:$0xff]  ;;  %v323_v24 = vand.u32 4294901760, %v285_v14  ;;  %v327_v25 = vand.u32 4294901760, %v287_v15  ;;  %v329_v26 = vand.u32 4294901760, %v290_v16 }
  0x9e   : > { %v3346_v21 = vpack.c.bf16 %v319_v11, %v315_v7  ;;  %v3348_v22 = vpack.c.bf16 %v325_v13, %v321_v12  ;;  %v294_v23 = vld [vmem:[%s3320_s19 + $0x68] sm:$0xff]  ;;  %v333_v27 = vand.u32 4294901760, %v292_v18  ;;  %v331_v28 = vand.u32 4294901760, %v289_v19  ;;  %v296_v30 = vld [vmem:[%s3320_s19 + $0x78] sm:$0xff]  ;;  %v293_v31 = vld [vmem:[%s3320_s19 + $0x60] sm:$0xff] }
  0x9f   : > { %4225 = vst [vmem:[#allocation21_spill] sm:$0xff] %v3341_v17  ;;  %2319 = vmatprep.subr.bf16.mxu0 %v3341_v17  ;;  %v335_v29 = vand.u32 4294901760, %v291_v20  ;;  %v3356_v32 = vpack.c.bf16 %v327_v25, %v323_v24  ;;  %v337_v33 = vand.u32 4294901760, %v294_v23  ;;  %v295_v34 = vld [vmem:[%s3320_s19 + $0x70] sm:$0xff]  ;;  %v298_v35 = vld [vmem:[%s3320_s19 + $0x88] sm:$0xff]  ;;  %v300_v36 = vld [vmem:[%s3320_s19 + $0x98] sm:$0xff]  ;;  %v3361_v37 = vsub.f32 %v282_v1, %v313_v4 }
  0xa0   : > { %4226 = vst [vmem:[#allocation22_spill] sm:$0xff] %v3346_v21  ;;  %4227 = vst [vmem:[#allocation23_spill] sm:$0xff] %v3348_v22  ;;  %2321 = vmatpush1.bf16.msra.mxu0 %v3346_v21  ;;  %v3363_v38 = vsub.f32 %v284_v2, %v317_v5  ;;  %v3365_v39 = vsub.f32 %v281_v3, %v315_v7  ;;  %v3367_v40 = vpack.c.bf16 %v333_v27, %v329_v26  ;;  %v297_v49 = vld [vmem:[%s3320_s19 + $0x80] sm:$0xff]  ;;  %v299_v50 = vld [vmem:[%s3320_s19 + $0x90] sm:$0xff] }
  0xa1   : > { %2323 = vmatprep.subr.bf16.mxu0 %v3348_v22  ;;  %4228 = vst [vmem:[#allocation24_spill] sm:$0xff] %v3356_v32  ;;  %v3369_v41 = vsub.f32 %v283_v6, %v319_v11  ;;  %v3371_v42 = vsub.f32 %v286_v8, %v321_v12  ;;  %v3373_v43 = vpack.c.bf16 %v335_v29, %v331_v28  ;;  %v341_v44 = vand.u32 4294901760, %v296_v30  ;;  %v302_v55 = vld [vmem:[%s3320_s19 + $0xa8] sm:$0xff]  ;;  %v304_v56 = vld [vmem:[%s3320_s19 + $0xb8] sm:$0xff]  ;;  %v301_v57 = vld [vmem:[%s3320_s19 + $0xa0] sm:$0xff] }
  0xa2   : > { %4229 = vst [vmem:[#allocation25_spill] sm:$0xff] %v3367_v40  ;;  %v339_v45 = vand.u32 4294901760, %v293_v31  ;;  %v343_v46 = vand.u32 4294901760, %v295_v34  ;;  %v345_v47 = vand.u32 4294901760, %v298_v35  ;;  %v349_v48 = vand.u32 4294901760, %v300_v36  ;;  %v303_v62 = vld [vmem:[%s3320_s19 + $0xb0] sm:$0xff] }
  0xa3   : > { %4230 = vst [vmem:[#allocation26_spill] sm:$0xff] %v3373_v43  ;;  %v3378_v51 = vsub.f32 %v288_v9, %v325_v13  ;;  %v3380_v52 = vsub.f32 %v285_v14, %v323_v24  ;;  %v3382_v53 = vsub.f32 %v287_v15, %v327_v25  ;;  %v3385_v54 = vpack.c.bf16 %v341_v44, %v337_v33  ;;  %v306_v63 = vld [vmem:[%s3320_s19 + $0xc8] sm:$0xff]  ;;  %v308_v0 = vld [vmem:[%s3320_s19 + $0xd8] sm:$0xff]  ;;  %v305_v9 = vld [vmem:[%s3320_s19 + $0xc0] sm:$0xff] }
  0xa4   : > { %2325 = vmatpush1.bf16.msra.mxu0 %v3356_v32  ;;  %v3390_v58 = vsub.f32 %v290_v16, %v329_v26  ;;  %v3392_v59 = vsub.f32 %v292_v18, %v333_v27  ;;  %v3394_v60 = vsub.f32 %v289_v19, %v331_v28  ;;  %v3396_v61 = vsub.f32 %v291_v20, %v335_v29  ;;  %v307_v11 = vld [vmem:[%s3320_s19 + $0xd0] sm:$0xff] }
  0xa5   : > { %2327 = vmatprep.subr.bf16.mxu0 %v3367_v40  ;;  %4231 = vst [vmem:[#allocation27_spill] sm:$0xff] %v3385_v54  ;;  %v3401_v1 = vsub.f32 %v294_v23, %v337_v33  ;;  %v3403_v2 = vsub.f32 %v296_v30, %v341_v44  ;;  %v347_v3 = vand.u32 4294901760, %v297_v49  ;;  %v351_v4 = vand.u32 4294901760, %v299_v50  ;;  %v280_v27 = vld [vmem:[%s3312_s21] sm:$0xff]  ;;  %v310_v44 = vld [vmem:[%s3320_s19 + $0xe8] sm:$0xff] }
  0xa6   : > { %v3406_v5 = vpack.c.bf16 %v343_v46, %v339_v45  ;;  %v3408_v6 = vpack.c.bf16 %v349_v48, %v345_v47  ;;  %v353_v7 = vand.u32 4294901760, %v302_v55  ;;  %v357_v8 = vand.u32 4294901760, %v304_v56 }
  0xa7   : > { %v355_v12 = vand.u32 4294901760, %v301_v57  ;;  %v359_v13 = vand.u32 4294901760, %v303_v62  ;;  %v361_v14 = vand.u32 4294901760, %v306_v63  ;;  %v365_v15 = vand.u32 4294901760, %v308_v0 }
  0xa8   : > { %2329 = vmatpush1.bf16.msra.mxu0 %v3373_v43  ;;  %4232 = vst [vmem:[#allocation28_spill] sm:$0xff] %v3406_v5  ;;  %4233 = vst [vmem:[#allocation29_spill] sm:$0xff] %v3408_v6  ;;  %v3413_v16 = vsub.f32 %v293_v31, %v339_v45  ;;  %v3415_v18 = vsub.f32 %v295_v34, %v343_v46  ;;  %v3417_v19 = vsub.f32 %v298_v35, %v345_v47  ;;  %v312_v46 = vld [vmem:[%s3320_s19 + $0xf8] sm:$0xff] }
  0xa9   : > { %2331 = vmatprep.subr.bf16.mxu0 %v3385_v54  ;;  %v3419_v20 = vsub.f32 %v300_v36, %v349_v48  ;;  %v3421_v23 = vpack.c.bf16 %v351_v4, %v347_v3  ;;  %v3423_v24 = vsub.f32 %v297_v49, %v347_v3  ;;  %v363_v25 = vand.u32 4294901760, %v305_v9 }
  0xaa   : > { %v367_v26 = vand.u32 4294901760, %v307_v11  ;;  %v3427_v28 = vsub.f32 %v299_v50, %v351_v4  ;;  %v3429_v29 = vpack.c.bf16 %v357_v8, %v353_v7  ;;  %v3431_v30 = vsub.f32 %v302_v55, %v353_v7 }
  0xab   : > { %4234 = vst [vmem:[#allocation30_spill] sm:$0xff] %v3421_v23  ;;  %v3433_v31 = vsub.f32 %v304_v56, %v357_v8  ;;  %v3436_v33 = vpack.c.bf16 %v359_v13, %v355_v12  ;;  %v3438_v34 = vsub.f32 %v301_v57, %v355_v12  ;;  %v3440_v35 = vsub.f32 %v303_v62, %v359_v13  ;;  %v309_v57 = vld [vmem:[%s3320_s19 + $0xe0] sm:$0xff]  ;;  %v3460_v62 = vld [vmem:[%s3320_s19 + $0xf0] sm:$0xff] }
  0xac   : > { %2333 = vmatpush1.bf16.msra.mxu0 %v3406_v5  ;;  %4235 = vst [vmem:[#allocation31_spill] sm:$0xff] %v3429_v29  ;;  %v3442_v36 = vpack.c.bf16 %v365_v15, %v361_v14  ;;  %v3445_v45 = vsub.f32 %v306_v63, %v361_v14  ;;  %v4132_v47 = vand.u32 4294901760, %v3361_v37  ;;  %v4133_v48 = vand.u32 4294901760, %v3363_v38 }
  0xad   : > { %2335 = vmatprep.subr.bf16.mxu0 %v3408_v6  ;;  %4236 = vst [vmem:[#allocation32_spill] sm:$0xff] %v3436_v33  ;;  %v3450_v49 = vand.u32 4294901760, %v280_v27  ;;  %v3452_v50 = vsub.f32 %v308_v0, %v365_v15  ;;  %v3454_v55 = vpack.c.bf16 %v367_v26, %v363_v25  ;;  %v3456_v56 = vsub.f32 %v305_v9, %v363_v25 }
  0xae   : > { %4237 = vst [vmem:[#allocation33_spill] sm:$0xff] %v3442_v36  ;;  %v4136_v3 = vand.u32 4294901760, %v3365_v39  ;;  %v3464_v63 = vsub.f32 %v307_v11, %v367_v26  ;;  %v369_v4 = vand.u32 4294901760, %v310_v44  ;;  %v424_v7 = vsub.f32 %v3361_v37, %v4132_v47 }
  0xaf   : > { %4238 = vst [vmem:[#allocation34_spill] sm:$0xff] %v3452_v50  ;;  %4239 = vst [vmem:[#allocation35_spill] sm:$0xff] %v3454_v55  ;;  %v436_v0 = vsub.f32 %v3363_v38, %v4133_v48  ;;  %v373_v8 = vand.u32 4294901760, %v312_v46  ;;  %v3474_v9 = vsub.f32 %v280_v27, %v3450_v49  ;;  %v4137_v12 = vand.u32 4294901760, %v3369_v41 }
  0xb0   : > { %4240 = vst [vmem:[#allocation36_spill] sm:$0xff] %v3456_v56  ;;  %2337 = vmatpush1.bf16.msra.mxu0 %v3421_v23  ;;  %4241 = vst [vmem:[#allocation37_spill] sm:$0xff] %v3464_v63  ;;  %v4142_v11 = vand.u32 4294901760, %v3371_v42  ;;  %v371_v13 = vand.u32 4294901760, %v309_v57  ;;  %v4143_v15 = vand.u32 4294901760, %v3378_v51  ;;  %v425_v26 = vand.u32 4294901760, %v424_v7 }
  0xb1   : > { %2339 = vmatprep.subr.bf16.mxu0 %v3429_v29  ;;  %4242 = vst [vmem:[#allocation38_spill] sm:$0xff] %v3474_v9  ;;  %v437_v47 = vand.u32 4294901760, %v436_v0  ;;  %v430_v27 = vsub.f32 %v3365_v39, %v4136_v3  ;;  %v442_v10 = vsub.f32 %v3369_v41, %v4137_v12  ;;  %v4152_v0 = vand.u32 4294901760, %v3382_v53 }
  0xb2   : > { %v448_v14 = vsub.f32 %v3371_v42, %v4142_v11  ;;  %v460_v7 = vsub.f32 %v3378_v51, %v4143_v15  ;;  %v3497_v48 = vpack.c.bf16 %v373_v8, %v369_v4  ;;  %v3499_v3 = vsub.f32 %v310_v44, %v369_v4 }
  0xb3   : > { %v3501_v25 = vsub.f32 %v312_v46, %v373_v8  ;;  %v4246_v11 = vand.u32 4294901760, %v3380_v52  ;;  %v4157_v23 = vand.u32 4294901760, %v3392_v59  ;;  %v2350_v44 = vpack.c.bf16 %v437_v47, %v425_v26 }
  0xb4   : > { %2341 = vmatpush1.bf16.msra.mxu0 %v3436_v33  ;;  %4243 = vst [vmem:[#allocation39_spill] sm:$0xff] %v3497_v48  ;;  %v4244_v33 = vand.u32 4294901760, %v3460_v62  ;;  %v4247_v46 = vand.u32 4294901760, %v3474_v9  ;;  %v431_v8 = vand.u32 4294901760, %v430_v27  ;;  %v449_v6 = vand.u32 4294901760, %v448_v14 }
  0xb5   : > { %2343 = vmatprep.subr.bf16.mxu0 %v3442_v36  ;;  %v454_v15 = vsub.f32 %v3380_v52, %v4246_v11  ;;  %v466_v36 = vsub.f32 %v3382_v53, %v4152_v0  ;;  %v461_v5 = vand.u32 4294901760, %v460_v7  ;;  %v4160_v11 = vand.u32 4294901760, %v3396_v61 }
  0xb6   : > { %v3506_v29 = vpack.c.bf16 %v4244_v33, %v371_v13  ;;  %v413_v4 = vsub.f32 %v3474_v9, %v4247_v46  ;;  %v443_v33 = vand.u32 4294901760, %v442_v10  ;;  %v4248_v0 = vand.u32 4294901760, %v3390_v58 }
  0xb7   : > { %v484_v26 = vsub.f32 %v3392_v59, %v4157_v23  ;;  %v4165_v27 = vand.u32 4294901760, %v3401_v1  ;;  %v4170_v46 = vand.u32 4294901760, %v3403_v2  ;;  %v455_v12 = vand.u32 4294901760, %v454_v15 }
  0xb8   : > { %4245 = vst [vmem:[#allocation40_spill] sm:$0xff] %v3506_v29  ;;  %2345 = vmatpush1.bf16.msra.mxu0 %v3454_v55  ;;  %v472_v47 = vsub.f32 %v3390_v58, %v4248_v0  ;;  %v467_v10 = vand.u32 4294901760, %v466_v36  ;;  %v4249_v14 = vand.u32 4294901760, %v3394_v60  ;;  %v414_v55 = vand.u32 4294901760, %v413_v4 }
  0xb9   : > { %2347 = vmatprep.subr.bf16.mxu0 %v3497_v48  ;;  %v490_v48 = vsub.f32 %v3396_v61, %v4160_v11  ;;  %v496_v0 = vsub.f32 %v3401_v1, %v4165_v27  ;;  %v508_v23 = vsub.f32 %v3403_v2, %v4170_v46  ;;  %v3544_v36 = vsub.f32 %v309_v57, %v371_v13 }
  0xba   : > { %v478_v7 = vsub.f32 %v3394_v60, %v4249_v14  ;;  %v2352_v14 = vpack.c.bf16 %v443_v33, %v431_v8  ;;  %v4181_v54 = vand.u32 4294901760, %v3415_v18  ;;  %v4175_v11 = vand.u32 4294901760, %v3417_v19 }
  0xbb   : > { %v2354_v4 = vpack.c.bf16 %v461_v5, %v449_v6  ;;  %v473_v43 = vand.u32 4294901760, %v472_v47  ;;  %v485_v40 = vand.u32 4294901760, %v484_v26  ;;  %v4174_v27 = vand.u32 4294901760, %v3419_v20 }
  0xbc   : > { %2349 = vmatpush1.bf16.msra.mxu0 %v3506_v29  ;;  %v2356_v32 = vpack.c.bf16 %v467_v10, %v455_v12  ;;  %v479_v22 = vand.u32 4294901760, %v478_v7  ;;  %v491_v46 = vand.u32 4294901760, %v490_v48  ;;  %v4173_v15 = vand.u32 4294901760, %v3423_v24 }
  0xbd   : > { %2351 = vmatprep.subr.bf16.mxu0 %v2350_v44  ;;  %v497_v29 = vand.u32 4294901760, %v496_v0  ;;  %v509_v57 = vand.u32 4294901760, %v508_v23  ;;  %v4250_v13 = vand.u32 4294901760, %v3413_v16  ;;  %v4176_v33 = vand.u32 4294901760, %v3427_v28 }
  0xbe   : > { %v514_v5 = vsub.f32 %v3415_v18, %v4181_v54  ;;  %v520_v6 = vsub.f32 %v3417_v19, %v4175_v11  ;;  %v532_v48 = vsub.f32 %v3419_v20, %v4174_v27  ;;  %v4251_v23 = vmov 0.0  }
  0xbf   : > { %415 = vmatmul.mubr.f32.vlgmr.msra.gmra.mrb[0].mxu0 %v414_v55  ;;  %v502_v8 = vsub.f32 %v3413_v16, %v4250_v13  ;;  %v2358_v55 = vpack.c.bf16 %v485_v40, %v473_v43  ;;  %v526_v12 = vsub.f32 %v3423_v24, %v4173_v15  ;;  %v4180_v44 = vand.u32 4294901760, %v3431_v30 }
  0xc0   : > { %2353 = vmatpush1.bf16.msra.mxu0 %v2352_v14  ;;  %645 = vmatprep.mubr.f32.mxu0 %v4251_v23  ;;  %v4179_v47 = vand.u32 4294901760, %v3433_v31  ;;  %v4252_v26 = vand.u32 4294901760, %v3460_v62  ;;  %v538_v7 = vsub.f32 %v3427_v28, %v4176_v33  ;;  %v4177_v0 = vand.u32 4294901760, %v3438_v34 }
  0xc1   : > { %2355 = vmatprep.subr.bf16.mxu0 %v2354_v4  ;;  %v4178_v40 = vand.u32 4294901760, %v3440_v35  ;;  %v2360_v43 = vpack.c.bf16 %v491_v46, %v479_v22  ;;  %v2362_v14 = vpack.c.bf16 %v509_v57, %v497_v29  ;;  %v503_v4 = vand.u32 4294901760, %v502_v8 }
  0xc2   : > { %v3572_v10 = vsub.f32 %v3460_v62, %v4252_v26  ;;  %v4184_v13 = vand.u32 4294901760, %v3445_v45  ;;  %v515_v15 = vand.u32 4294901760, %v514_v5  ;;  %v521_v27 = vand.u32 4294901760, %v520_v6 }
  0xc3   : > { %v533_v11 = vand.u32 4294901760, %v532_v48  ;;  %v579_v62 = vand.u32 4294901760, %v3452_v50  ;;  %v527_v26 = vand.u32 4294901760, %v526_v12  ;;  %v544_v33 = vsub.f32 %v3431_v30, %v4180_v44 }
  0xc4   : > { %2357 = vmatpush1.bf16.msra.mxu0 %v2356_v32  ;;  %v556_v22 = vsub.f32 %v3433_v31, %v4179_v47  ;;  %v573_v29 = vand.u32 4294901760, %v3456_v56  ;;  %v539_v46 = vand.u32 4294901760, %v538_v7  ;;  %v550_v32 = vsub.f32 %v3438_v34, %v4177_v0 }
  0xc5   : > { %2359 = vmatprep.subr.bf16.mxu0 %v2358_v55  ;;  %v562_v57 = vsub.f32 %v3440_v35, %v4178_v40  ;;  %v585_v8 = vand.u32 4294901760, %v3464_v63  ;;  %v568_v5 = vsub.f32 %v3445_v45, %v4184_v13  ;;  %v580_v6 = vsub.f32 %v3452_v50, %v579_v62 }
  0xc6   : > { %v591_v48 = vand.u32 4294901760, %v3499_v3  ;;  %v603_v55 = vand.u32 4294901760, %v3501_v25  ;;  %v2364_v12 = vpack.c.bf16 %v515_v15, %v503_v4  ;;  %v574_v7 = vsub.f32 %v3456_v56, %v573_v29 }
  0xc7   : > { %v586_v0 = vsub.f32 %v3464_v63, %v585_v8  ;;  %v597_v40 = vand.u32 4294901760, %v3544_v36  ;;  %v2366_v47 = vpack.c.bf16 %v533_v11, %v521_v27  ;;  %v545_v44 = vand.u32 4294901760, %v544_v33 }
  0xc8   : > { %2361 = vmatpush1.bf16.msra.mxu0 %v2360_v43  ;;  %v557_v54 = vand.u32 4294901760, %v556_v22  ;;  %v2368_v21 = vpack.c.bf16 %v539_v46, %v527_v26  ;;  %v551_v13 = vand.u32 4294901760, %v550_v32  ;;  %v563_v9 = vand.u32 4294901760, %v562_v57 }
  0xc9   : > { %2363 = vmatprep.subr.bf16.mxu0 %v2362_v14  ;;  %v569_v17 = vand.u32 4294901760, %v568_v5  ;;  %v581_v50 = vand.u32 4294901760, %v580_v6  ;;  %v592_v23 = vsub.f32 %v3499_v3, %v591_v48  ;;  %v604_v43 = vsub.f32 %v3501_v25, %v603_v55 }
  0xca   : > { %v575_v15 = vand.u32 4294901760, %v574_v7  ;;  %v587_v4 = vand.u32 4294901760, %v586_v0  ;;  %v598_v63 = vsub.f32 %v3544_v36, %v597_v40  ;;  %v609_v56 = vand.u32 4294901760, %v3572_v10 }
  0xcb   : > { %v2370_v11 = vpack.c.bf16 %v557_v54, %v545_v44  ;;  %v2372_v27 = vpack.c.bf16 %v563_v9, %v551_v13  ;;  %v2374_v33 = vpack.c.bf16 %v581_v50, %v569_v17  ;;  %v593_v14 = vand.u32 4294901760, %v592_v23 }
  0xcc   : > { %2365 = vmatpush1.bf16.msra.mxu0 %v2364_v12  ;;  %v605_v26 = vand.u32 4294901760, %v604_v43  ;;  %v2376_v22 = vpack.c.bf16 %v587_v4, %v575_v15  ;;  %v599_v46 = vand.u32 4294901760, %v598_v63  ;;  %v610_v32 = vsub.f32 %v3572_v10, %v609_v56 }
  0xcd   : > { %2367 = vmatprep.subr.bf16.mxu0 %v2366_v47  ;;  %v4253_v57 = vand.u32 4294901760, %v3361_v37  ;;  %v4254_v5 = vand.u32 4294901760, %v3363_v38  ;;  %v4255_v6 = vand.u32 4294901760, %v3365_v39  ;;  %v4256_v54 = vand.u32 4294901760, %v3369_v41 }
  0xce   : > { %v4257_v17 = vand.u32 4294901760, %v3371_v42  ;;  %v4259_v63 = vand.u32 4294901760, %v3380_v52  ;;  %v4260_v23 = vand.u32 4294901760, %v3382_v53  ;;  %v4261_v47 = vand.u32 4294901760, %v3390_v58 }
  0xcf   : > { %v3613_v0 = vpack.c.bf16 %v4254_v5, %v4253_v57  ;;  %v3619_v9 = vpack.c.bf16 %v4256_v54, %v4255_v6  ;;  %v4262_v13 = vand.u32 4294901760, %v3392_v59  ;;  %v4263_v7 = vand.u32 4294901760, %v3394_v60 }
  0xd0   : > { %2369 = vmatpush1.bf16.msra.mxu0 %v2368_v21  ;;  %v4258_v21 = vand.u32 4294901760, %v3378_v51  ;;  %v3631_v44 = vpack.c.bf16 %v4260_v23, %v4259_v63  ;;  %v4264_v43 = vand.u32 4294901760, %v3396_v61  ;;  %v4265_v4 = vand.u32 4294901760, %v3401_v1 }
  0xd1   : > { %2371 = vmatprep.subr.bf16.mxu0 %v2370_v11  ;;  %v3637_v12 = vpack.c.bf16 %v4262_v13, %v4261_v47  ;;  %v4266_v11 = vand.u32 4294901760, %v3403_v2  ;;  %v4267_v5 = vand.u32 4294901760, %v3413_v16  ;;  %v4268_v6 = vand.u32 4294901760, %v3415_v18 }
  0xd2   : > { %v3625_v50 = vpack.c.bf16 %v4258_v21, %v4257_v17  ;;  %v3643_v15 = vpack.c.bf16 %v4264_v43, %v4263_v7  ;;  %v4269_v17 = vand.u32 4294901760, %v3417_v19  ;;  %v4270_v21 = vand.u32 4294901760, %v3419_v20 }
  0xd3   : > { %v3649_v57 = vpack.c.bf16 %v4266_v11, %v4265_v4  ;;  %v3655_v54 = vpack.c.bf16 %v4268_v6, %v4267_v5  ;;  %v4272_v23 = vand.u32 4294901760, %v3423_v24  ;;  %v4273_v47 = vand.u32 4294901760, %v3427_v28 }
  0xd4   : > { %v3661_v63 = vpack.c.bf16 %v4270_v21, %v4269_v17  ;;  %v4275_v7 = vand.u32 4294901760, %v3431_v30  ;;  %v4276_v43 = vand.u32 4294901760, %v3433_v31  ;;  %v4277_v11 = vand.u32 4294901760, %v3438_v34  ;;  %2373 = vmatpush1.bf16.msra.mxu0 %v2372_v27 }
  0xd5   : > { %v3667_v13 = vpack.c.bf16 %v4273_v47, %v4272_v23  ;;  %v4278_v5 = vand.u32 4294901760, %v3440_v35  ;;  %v4279_v17 = vand.u32 4294901760, %v3445_v45  ;;  %v3685_v23 = vpack.c.bf16 %v585_v8, %v573_v29  ;;  %2375 = vmatprep.subr.bf16.mxu0 %v2374_v33  ;;  %v4298_v8 = vld [vmem:[#allocation35_spill] sm:$0xff] }
  0xd6   : > { %4271 = vst [vmem:[#allocation41_spill] sm:$0xff] %v3661_v63  ;;  %v3673_v4 = vpack.c.bf16 %v4276_v43, %v4275_v7  ;;  %v611_v63 = vand.u32 4294901760, %v610_v32  ;;  %v3687_v47 = vpack.c.bf16 %v603_v55, %v591_v48  ;;  %v2378_v7 = vpack.c.bf16 %v605_v26, %v593_v14  ;;  %v4299_v48 = vld [vmem:[#allocation39_spill] sm:$0xff]  ;;  %v4300_v55 = vld [vmem:[#allocation40_spill] sm:$0xff] }
  0xd7   : > { %4274 = vst [vmem:[#allocation42_spill] sm:$0xff] %v3667_v13  ;;  %v3679_v6 = vpack.c.bf16 %v4278_v5, %v4277_v11  ;;  %v3683_v21 = vpack.c.bf16 %v579_v62, %v4279_v17  ;;  %v3689_v13 = vpack.c.bf16 %v609_v56, %v597_v40  ;;  %v2382_v11 = vpack.c.bf16 %v3363_v38, %v3361_v37  ;;  %v1177_v26 = vld [vmem:[%s3326_s3] sm:$0xff]  ;;  %v1183_v5 = vld [vmem:[%s3326_s3 + $0x30] sm:$0xff] }
  0xd8   : > { %2377 = vmatpush1.bf16.msra.mxu0 %v2376_v22  ;;  %v2380_v43 = vpack.c.bf16 %v611_v63, %v599_v46  ;;  %v2384_v62 = vpack.c.bf16 %v3369_v41, %v3365_v39  ;;  %v2386_v29 = vpack.c.bf16 %v3378_v51, %v3371_v42  ;;  %v2388_v56 = vpack.c.bf16 %v3382_v53, %v3380_v52  ;;  %v1178_v22 = vld [vmem:[%s3326_s3 + $0x8] sm:$0xff] }
  0xd9   : > { %2379 = vmatprep.subr.bf16.mxu0 %v2378_v7  ;;  %v4280_v40 = vmov 0.0   ;;  %v2390_v37 = vpack.c.bf16 %v3392_v59, %v3390_v58  ;;  %v2392_v38 = vpack.c.bf16 %v3396_v61, %v3394_v60  ;;  %v2394_v39 = vpack.c.bf16 %v3403_v2, %v3401_v1  ;;  %v4281_v58 = vld [vmem:[#allocation34_spill] sm:$0xff]  ;;  %v4282_v60 = vld [vmem:[#allocation36_spill] sm:$0xff]  ;;  %v4283_v61 = vld [vmem:[#allocation37_spill] sm:$0xff] }
  0xda   : > { %v2396_v41 = vpack.c.bf16 %v3415_v18, %v3413_v16  ;;  %v2398_v42 = vpack.c.bf16 %v3419_v20, %v3417_v19  ;;  %v2400_v51 = vpack.c.bf16 %v3427_v28, %v3423_v24  ;;  %v2402_v52 = vpack.c.bf16 %v3433_v31, %v3431_v30  ;;  %v4284_v18 = vld [vmem:[#allocation21_spill] sm:$0xff]  ;;  %v4285_v19 = vld [vmem:[#allocation38_spill] sm:$0xff]  ;;  %v4287_v24 = vld [vmem:[#allocation23_spill] sm:$0xff]  ;;  %2140 = vmatprep.mubr.msk.f32.mxu1 %vm3016_vm0, %v4280_v40 }
  0xdb   : > { %v2404_v53 = vpack.c.bf16 %v3440_v35, %v3438_v34  ;;  %v2406_v59 = vpack.c.bf16 %v4281_v58, %v3445_v45  ;;  %v2408_v1 = vpack.c.bf16 %v4283_v61, %v4282_v60  ;;  %v2410_v2 = vpack.c.bf16 %v3501_v25, %v3499_v3  ;;  %v4286_v20 = vld [vmem:[#allocation22_spill] sm:$0xff]  ;;  %v4288_v28 = vld [vmem:[#allocation24_spill] sm:$0xff]  ;;  %v4289_v30 = vld [vmem:[#allocation25_spill] sm:$0xff] }
  0xdc   : > { %2381 = vmatpush1.bf16.msra.mxu0 %v2380_v43  ;;  %v2412_v16 = vpack.c.bf16 %v3572_v10, %v3544_v36  ;;  %v4290_v31 = vld [vmem:[#allocation26_spill] sm:$0xff]  ;;  %v4291_v34 = vld [vmem:[#allocation27_spill] sm:$0xff]  ;;  %v4292_v35 = vld [vmem:[#allocation28_spill] sm:$0xff]  ;;  %v4301_v27 = vand.u32 4294901760, %v4285_v19  ;;  %v1194_v46 = vand.u32 4294901760, %v1177_v26  ;;  %v1197_v32 = vand.u32 4294901760, %v1178_v22 }
  0xdd   : > { %2383 = vmatprep.subr.bf16.mxu0 %v2382_v11  ;;  %v4293_v45 = vld [vmem:[#allocation29_spill] sm:$0xff]  ;;  %v4294_v3 = vld [vmem:[#allocation30_spill] sm:$0xff]  ;;  %v4295_v25 = vld [vmem:[#allocation31_spill] sm:$0xff]  ;;  %v1212_v17 = vand.u32 4294901760, %v1183_v5 }
  0xde   : > { %v4296_v36 = vld [vmem:[#allocation32_spill] sm:$0xff]  ;;  %v4297_v10 = vld [vmem:[#allocation33_spill] sm:$0xff]  ;;  %v4303_v14 = vld [vmem:[#allocation42_spill] sm:$0xff]  ;;  %v3822_v58 = vsub.f32 %v1178_v22, %v1197_v32 }
  0xdf   : > { %647 = vmatmul.mubr.f32.vlgmr.msra.gmra.mrb[0].mxu0 %v3450_v49  ;;  %v4302_v33 = vld [vmem:[#allocation41_spill] sm:$0xff]  ;;  %v1186_v7 = vld [vmem:[%s3326_s3 + $0x48] sm:$0xff] }
  0xe0   : > { %2385 = vmatpush1.bf16.msra.mxu0 %v2384_v62  ;;  %781 = vmatprep.mubr.f32.mxu0 %v4280_v40  ;;  %v1221_v11 = vand.u32 4294901760, %v1186_v7 }
  0xe1   : > { %2387 = vmatprep.subr.bf16.mxu0 %v2386_v29  ;;  %v1187_v29 = vld [vmem:[%s3326_s3 + $0x50] sm:$0xff] }
  0xe4   : > { %2389 = vmatpush1.bf16.msra.mxu0 %v2388_v56  ;;  %v1188_v56 = vld [vmem:[%s3326_s3 + $0x58] sm:$0xff] }
  0xe5   : > { %2391 = vmatprep.subr.bf16.mxu0 %v2390_v37  ;;  %v1224_v37 = vand.u32 4294901760, %v1187_v29 }
  0xe8   : > { %2393 = vmatpush1.bf16.msra.mxu0 %v2392_v38  ;;  %v1227_v38 = vand.u32 4294901760, %v1188_v56 }
  0xe9   : > { %2395 = vmatprep.subr.bf16.mxu0 %v2394_v39 }
  0xea   : > { %v3814_v39 = vpack.c.bf16 %v1227_v38, %v1224_v37 }
  0xec   : > { %2397 = vmatpush1.bf16.msra.mxu0 %v2396_v41  ;;  %v1189_v41 = vld [vmem:[%s3326_s3 + $0x60] sm:$0xff] }
  0xed   : > { %2399 = vmatprep.subr.bf16.mxu0 %v2398_v42  ;;  %v1190_v42 = vld [vmem:[%s3326_s3 + $0x68] sm:$0xff] }
  0xf0   : > { %2401 = vmatpush1.bf16.msra.mxu0 %v2400_v51  ;;  %v1230_v51 = vand.u32 4294901760, %v1189_v41 }
  0xf1   : > { %2403 = vmatprep.subr.bf16.mxu0 %v2402_v52  ;;  %v1233_v52 = vand.u32 4294901760, %v1190_v42 }
  0xf4   : > { %2405 = vmatpush1.bf16.msra.mxu0 %v2404_v53  ;;  %v3820_v53 = vsub.f32 %v1177_v26, %v1194_v46 }
  0xf5   : > { %2407 = vmatprep.subr.bf16.mxu0 %v2406_v59  ;;  %v3824_v59 = vpack.c.bf16 %v1233_v52, %v1230_v51 }
  0xf8   : > { %2409 = vmatpush1.bf16.msra.mxu0 %v2408_v1 }
  0xf9   : > { %2411 = vmatprep.subr.bf16.mxu0 %v2410_v2 }
  0xfc   : > { %2413 = vmatpush1.bf16.msra.mxu0 %v2412_v16  ;;  %v1191_v16 = vld [vmem:[%s3326_s3 + $0x70] sm:$0xff] }
  0xfd   : > { %2415 = vmatprep.subr.bf16.mxu0 %v4284_v18 }
  0xff   : > { %784 = vmatmul.mubr.f32.vlgmr.msra.gmra.mrb[0].mxu0 %v4285_v19  ;;  %v3837_v19 = vsub.f32 %v1183_v5, %v1212_v17 }
 0x100   : > { %2417 = vmatpush1.bf16.msra.mxu0 %v4286_v20  ;;  %886 = vmatprep.mubr.f32.mxu0 %v4280_v40 }
 0x101   : > { %2419 = vmatprep.subr.bf16.mxu0 %v4287_v24 }
 0x104   : > { %2421 = vmatpush1.bf16.msra.mxu0 %v4288_v28 }
 0x105   : > { %2423 = vmatprep.subr.bf16.mxu0 %v4289_v30 }
 0x108   : > { %2425 = vmatpush1.bf16.msra.mxu0 %v4290_v31 }
 0x109   : > { %2427 = vmatprep.subr.bf16.mxu0 %v4291_v34 }
 0x10c   : > { %2429 = vmatpush1.bf16.msra.mxu0 %v4292_v35 }
 0x10d   : > { %2431 = vmatprep.subr.bf16.mxu0 %v4293_v45 }
 0x110   : > { %2433 = vmatpush1.bf16.msra.mxu0 %v4294_v3 }
 0x111   : > { %2435 = vmatprep.subr.bf16.mxu0 %v4295_v25 }
 0x114   : > { %2437 = vmatpush1.bf16.msra.mxu0 %v4296_v36 }
 0x115   : > { %2439 = vmatprep.subr.bf16.mxu0 %v4297_v10 }
 0x118   : > { %2441 = vmatpush1.bf16.msra.mxu0 %v4298_v8 }
 0x119   : > { %2443 = vmatprep.subr.bf16.mxu0 %v4299_v48 }
 0x11c   : > { %2445 = vmatpush1.bf16.msra.mxu0 %v4300_v55 }
 0x11d   : > { %2447 = vmatprep.subr.bf16.mxu0 %v3613_v0  ;;  %v3783_v0 = vpack.c.bf16 %v1197_v32, %v1194_v46 }
 0x11f   : > { %890 = vmatmul.mubr.f32.vlgmr.msra.gmra.mrb[0].mxu0 %v4301_v27 }
 0x120   : > { %2449 = vmatpush1.bf16.msra.mxu0 %v3619_v9  ;;  %1056 = vmatprep.mubr.f32.mxu0 %v4280_v40  ;;  %v3015_v9 = vmov 0.0|0.0  }
 0x121   : > { %2451 = vmatprep.subr.bf16.mxu0 %v3625_v50  ;;  %2510 = vmatprep.subr.bf16.mxu1 %v3015_v9  ;;  %v1179_v50 = vld [vmem:[%s3326_s3 + $0x10] sm:$0xff] }
 0x122   : > { %2512 = vmatpush3.bf16.msra.mxu1 %v3783_v0 }
 0x123   : > { %2513 = vmatprep.subr.bf16.mxu1 %v3015_v9 }
 0x124   : > { %2453 = vmatpush1.bf16.msra.mxu0 %v3631_v44  ;;  %v1180_v44 = vld [vmem:[%s3326_s3 + $0x18] sm:$0xff] }
 0x125   : > { %2455 = vmatprep.subr.bf16.mxu0 %v3637_v12  ;;  %v1200_v12 = vand.u32 4294901760, %v1179_v50 }
 0x127   : > { %v3826_v60 = vsub.f32 %v1179_v50, %v1200_v12 }
 0x128   : > { %2457 = vmatpush1.bf16.msra.mxu0 %v3643_v15  ;;  %v1203_v15 = vand.u32 4294901760, %v1180_v44 }
 0x129   : > { %2459 = vmatprep.subr.bf16.mxu0 %v3649_v57  ;;  %v1181_v57 = vld [vmem:[%s3326_s3 + $0x20] sm:$0xff] }
 0x12a   : > { %v1206_v63 = vand.u32 4294901760, %v1181_v57  ;;  %v3828_v61 = vsub.f32 %v1180_v44, %v1203_v15 }
 0x12c   : > { %2461 = vmatpush1.bf16.msra.mxu0 %v3655_v54  ;;  %v1182_v54 = vld [vmem:[%s3326_s3 + $0x28] sm:$0xff]  ;;  %v3830_v1 = vsub.f32 %v1181_v57, %v1206_v63 }
 0x12d   : > { %2463 = vmatprep.subr.bf16.mxu0 %v4302_v33  ;;  %v1301_v33 = vand.u32 4294901760, %v3826_v60 }
 0x12e   : > { %v1315_v50 = vand.u32 4294901760, %v3830_v1 }
 0x12f   : > { %v1302_v46 = vsub.f32 %v3826_v60, %v1301_v33 }
 0x130   : > { %2465 = vmatpush1.bf16.msra.mxu0 %v4303_v14  ;;  %v1308_v14 = vand.u32 4294901760, %v3828_v61 }
 0x131   : > { %2467 = vmatprep.subr.bf16.mxu0 %v3673_v4 }
 0x132   : > { %v1309_v32 = vsub.f32 %v3828_v61, %v1308_v14 }
 0x134   : > { %2469 = vmatpush1.bf16.msra.mxu0 %v3679_v6  ;;  %v1184_v6 = vld [vmem:[%s3326_s3 + $0x38] sm:$0xff]  ;;  %v1310_v57 = vand.u32 4294901760, %v1309_v32 }
 0x135   : > { %2471 = vmatprep.subr.bf16.mxu0 %v3683_v21  ;;  %v1215_v21 = vand.u32 4294901760, %v1184_v6 }
 0x138   : > { %2473 = vmatpush1.bf16.msra.mxu0 %v3685_v23  ;;  %v3802_v23 = vpack.c.bf16 %v1215_v21, %v1212_v17  ;;  %v1329_v17 = vand.u32 4294901760, %v3837_v19 }
 0x139   : > { %2475 = vmatprep.subr.bf16.mxu0 %v3687_v47  ;;  %v1185_v47 = vld [vmem:[%s3326_s3 + $0x40] sm:$0xff] }
 0x13a   : > { %v1218_v43 = vand.u32 4294901760, %v1185_v47 }
 0x13c   : > { %2477 = vmatpush1.bf16.msra.mxu0 %v3689_v13  ;;  %v1209_v13 = vand.u32 4294901760, %v1182_v54  ;;  %v3808_v62 = vpack.c.bf16 %v1221_v11, %v1218_v43 }
 0x13d   : > { %2479 = vmatprep.subr.bf16.mxu0 %v4284_v18  ;;  %v1192_v18 = vld [vmem:[%s3326_s3 + $0x78] sm:$0xff] }
 0x13e   : > { %v3796_v4 = vpack.c.bf16 %v1209_v13, %v1206_v63  ;;  %v3832_v2 = vsub.f32 %v1182_v54, %v1209_v13  ;;  %v1316_v54 = vsub.f32 %v3830_v1, %v1315_v50 }
 0x13f   : > { %1058 = vmatmul.mubr.f32.vlgmr.msra.gmra.mrb[0].mxu0 %v3450_v49 }
 0x140   : > { %2481 = vmatpush1.bf16.msra.mxu0 %v4286_v20  ;;  %1160 = vmatprep.mubr.f32.mxu0 %v4280_v40  ;;  %v3839_v20 = vsub.f32 %v1184_v6, %v1215_v21  ;;  %v1322_v44 = vand.u32 4294901760, %v3832_v2  ;;  %v1317_v5 = vand.u32 4294901760, %v1316_v54 }
 0x141   : > { %2483 = vmatprep.subr.bf16.mxu0 %v4287_v24  ;;  %v3841_v24 = vsub.f32 %v1185_v47, %v1218_v43 }
 0x142   : > { %v1323_v63 = vsub.f32 %v3832_v2, %v1322_v44  ;;  %v1336_v21 = vand.u32 4294901760, %v3839_v20 }
 0x144   : > { %2485 = vmatpush1.bf16.msra.mxu0 %v4288_v28  ;;  %v3843_v28 = vsub.f32 %v1186_v7, %v1221_v11  ;;  %v1324_v6 = vand.u32 4294901760, %v1323_v63  ;;  %v1330_v7 = vsub.f32 %v3837_v19, %v1329_v17  ;;  %v1337_v43 = vsub.f32 %v3839_v20, %v1336_v21 }
 0x145   : > { %2487 = vmatprep.subr.bf16.mxu0 %v4289_v30  ;;  %v3846_v30 = vsub.f32 %v1187_v29, %v1224_v37 }
 0x146   : > { %v2541_v47 = vpack.c.bf16 %v1324_v6, %v1317_v5  ;;  %v1331_v11 = vand.u32 4294901760, %v1330_v7  ;;  %v1338_v29 = vand.u32 4294901760, %v1337_v43  ;;  %v4198_v37 = vand.u32 4294901760, %v3843_v28 }
 0x148   : > { %2489 = vmatpush1.bf16.msra.mxu0 %v4290_v31  ;;  %v3848_v31 = vsub.f32 %v1188_v56, %v1227_v38  ;;  %v1343_v56 = vand.u32 4294901760, %v3841_v24  ;;  %v2544_v38 = vpack.c.bf16 %v1338_v29, %v1331_v11 }
 0x149   : > { %2491 = vmatprep.subr.bf16.mxu0 %v4291_v34  ;;  %v3850_v34 = vsub.f32 %v1189_v41, %v1230_v51 }
 0x14a   : > { %v1344_v41 = vsub.f32 %v3841_v24, %v1343_v56 }
 0x14c   : > { %2493 = vmatpush1.bf16.msra.mxu0 %v4292_v35  ;;  %v3852_v35 = vsub.f32 %v1190_v42, %v1233_v52  ;;  %v1351_v42 = vsub.f32 %v3843_v28, %v4198_v37  ;;  %v1345_v51 = vand.u32 4294901760, %v1344_v41 }
 0x14d   : > { %2495 = vmatprep.subr.bf16.mxu0 %v4293_v45  ;;  %v1236_v45 = vand.u32 4294901760, %v1191_v16 }
 0x14e   : > { %v1352_v52 = vand.u32 4294901760, %v1351_v42 }
 0x150   : > { %2497 = vmatpush1.bf16.msra.mxu0 %v4294_v3  ;;  %v1239_v3 = vand.u32 4294901760, %v1192_v18 }
 0x151   : > { %2499 = vmatprep.subr.bf16.mxu0 %v4295_v25  ;;  %v1287_v25 = vand.u32 4294901760, %v3820_v53 }
 0x154   : > { %2501 = vmatpush1.bf16.msra.mxu0 %v4296_v36  ;;  %v1294_v36 = vand.u32 4294901760, %v3822_v58 }
 0x155   : > { %2503 = vmatprep.subr.bf16.mxu0 %v4297_v10  ;;  %v3858_v10 = vpack.c.bf16 %v1239_v3, %v1236_v45 }
 0x156   : > { %v1295_v27 = vsub.f32 %v3822_v58, %v1294_v36 }
 0x158   : > { %2505 = vmatpush1.bf16.msra.mxu0 %v4298_v8  ;;  %v3860_v8 = vsub.f32 %v1191_v16, %v1236_v45  ;;  %v1296_v22 = vand.u32 4294901760, %v1295_v27  ;;  %v4197_v16 = vand.u32 4294901760, %v3846_v30  ;;  %v2547_v45 = vpack.c.bf16 %v1352_v52, %v1345_v51 }
 0x159   : > { %2507 = vmatprep.subr.bf16.mxu0 %v4299_v48  ;;  %v3862_v48 = vsub.f32 %v1192_v18, %v1239_v3  ;;  %v4196_v18 = vand.u32 4294901760, %v3848_v31  ;;  %v2559_v51 = vpack.c.bf16 %v3822_v58, %v3820_v53  ;;  %v2562_v52 = vpack.c.bf16 %v3828_v61, %v3826_v60 }
 0x15a   : > { %v1358_v3 = vsub.f32 %v3846_v30, %v4197_v16  ;;  %v4193_v5 = vand.u32 4294901760, %v3860_v8  ;;  %v2616_v58 = vpack.c.bf16 %v1336_v21, %v1329_v17  ;;  %v4304_v60 = vand.u32 4294901760, %v3843_v28 }
 0x15b   : > { %v4192_v6 = vand.u32 4294901760, %v3862_v48 }
 0x15c   : > { %2509 = vmatpush1.bf16.msra.mxu0 %v4300_v55  ;;  %v1288_v55 = vsub.f32 %v3820_v53, %v1287_v25  ;;  %v1359_v27 = vand.u32 4294901760, %v1358_v3  ;;  %v1386_v43 = vsub.f32 %v3860_v8, %v4193_v5  ;;  %v2565_v3 = vpack.c.bf16 %v3832_v2, %v3830_v1 }
 0x15d   : > { %v1393_v11 = vsub.f32 %v3862_v48, %v4192_v6  ;;  %v2613_v53 = vpack.c.bf16 %v1322_v44, %v1315_v50  ;;  %v2619_v61 = vpack.c.bf16 %v4304_v60, %v1343_v56  ;;  %v4305_v1 = vand.u32 4294901760, %v3846_v30 }
 0x15e   : > { %v1289_v26 = vand.u32 4294901760, %v1288_v55  ;;  %v1365_v55 = vsub.f32 %v3848_v31, %v4196_v18  ;;  %v1387_v29 = vand.u32 4294901760, %v1386_v43  ;;  %v4306_v2 = vand.u32 4294901760, %v3848_v31 }
 0x15f   : > { %1162 = vmatmul.mubr.f32.vlgmr.msra.gmra.mrb[0].mxu0 %v3450_v49  ;;  %v3790_v49 = vpack.c.bf16 %v1203_v15, %v1200_v12  ;;  %v1303_v15 = vand.u32 4294901760, %v1302_v46  ;;  %v4194_v46 = vand.u32 4294901760, %v3852_v35  ;;  %v1394_v41 = vand.u32 4294901760, %v1393_v11 }
 0x160   : > { %v3882_v12 = vpack.c.bf16 %v1296_v22, %v1289_v26  ;;  %v1366_v26 = vand.u32 4294901760, %v1365_v55  ;;  %v4195_v22 = vand.u32 4294901760, %v3850_v34  ;;  %v2568_v55 = vpack.c.bf16 %v3839_v20, %v3837_v19 }
 0x161   : > { %2515 = vmatpush3.bf16.msra.mxu1 %v3790_v49  ;;  %v3890_v13 = vpack.c.bf16 %v1310_v57, %v1303_v15  ;;  %v1379_v57 = vsub.f32 %v3852_v35, %v4194_v46  ;;  %v2556_v42 = vpack.c.bf16 %v1394_v41, %v1387_v29  ;;  %v4307_v19 = vand.u32 4294901760, %v3850_v34 }
 0x162   : > { %2516 = vmatprep.subr.bf16.mxu1 %v3015_v9  ;;  %v2550_v32 = vpack.c.bf16 %v1366_v26, %v1359_v27  ;;  %v1372_v15 = vsub.f32 %v3850_v34, %v4195_v22  ;;  %v2571_v27 = vpack.c.bf16 %v3843_v28, %v3841_v24  ;;  %v2574_v26 = vpack.c.bf16 %v3848_v31, %v3846_v30 }
 0x163   : > { %v1380_v63 = vand.u32 4294901760, %v1379_v57  ;;  %v2580_v57 = vpack.c.bf16 %v3862_v48, %v3860_v8  ;;  %v4308_v20 = vand.u32 4294901760, %v3852_v35  ;;  %v4309_v24 = vand.u32 4294901760, %v3860_v8 }
 0x164   : > { %v1373_v54 = vand.u32 4294901760, %v1372_v15  ;;  %v2577_v15 = vpack.c.bf16 %v3852_v35, %v3850_v34  ;;  %v4310_v28 = vand.u32 4294901760, %v3862_v48 }
 0x165   : > { %2518 = vmatpush3.bf16.msra.mxu1 %v3796_v4 }
 0x166   : > { %2519 = vmatprep.subr.bf16.mxu1 %v3015_v9  ;;  %v2553_v7 = vpack.c.bf16 %v1380_v63, %v1373_v54 }
 0x169   : > { %2521 = vmatpush3.bf16.msra.mxu1 %v3802_v23 }
 0x16a   : > { %2522 = vmatprep.subr.bf16.mxu1 %v3015_v9 }
 0x16d   : > { %2524 = vmatpush3.bf16.msra.mxu1 %v3808_v62 }
 0x16e   : > { %2525 = vmatprep.subr.bf16.mxu1 %v3015_v9 }
 0x171   : > { %2527 = vmatpush3.bf16.msra.mxu1 %v3814_v39 }
 0x172   : > { %2528 = vmatprep.subr.bf16.mxu1 %v3015_v9 }
 0x175   : > { %2530 = vmatpush3.bf16.msra.mxu1 %v3824_v59 }
 0x176   : > { %2531 = vmatprep.subr.bf16.mxu1 %v3015_v9 }
 0x179   : > { %2533 = vmatpush3.bf16.msra.mxu1 %v3858_v10 }
 0x17a   : > { %2534 = vmatprep.subr.bf16.mxu1 %v3015_v9 }
 0x232   : > { %v1163_v54 = vpop.f32.mrb[0].mxu0 }
 0x233   : > { %v1998_v63 = vmul.f32 -1.442695, %v1163_v54  ;;  %v1165_v43 = vpop.f32.mrb[1].mxu0 }
 0x235   : > { %2784 = vpow2.f32 %v1998_v63 }
 0x23f   : > { %v2785_v11 = vpop.eup %2784 }
 0x240   : > { %v1171_v29 = vadd.f32 1.0, %v2785_v11 }
 0x242   : > { %2786 = vrcp.f32 %v1171_v29 }
 0x24c   : > { %v2787_v41 = vpop.eup %2786 }
 0x24d   : > { %v1174_v6 = vmul.f32 %v2787_v41, %v1163_v54 }
 0x24f   : > { %v1175_v5 = vmul.f32 %v1174_v6, %v1165_v43 }
 0x251   : > { %v3948_v46 = vand.u32 4294901760, %v1175_v5 }
 0x253   : > { %v1275_v22 = vsub.f32 %v1175_v5, %v3948_v46 }
 0x255   : > { %v1276_v18 = vand.u32 4294901760, %v1275_v22 }
 0x257   : > { %v1277_v16 = vsub.f32 %v1275_v22, %v1276_v18 }
 0x259   : > { %v1278_v37 = vand.u32 4294901760, %v1277_v16 }
 0x25b   : > { %2141 = vmatmul.mubr.f32.vlgmr.msra.gmra.mrb[0].mxu1 %v1278_v37 }
 0x25c   : > { %2536 = vmatpush3.bf16.msra.mxu1 %v3882_v12  ;;  %2175 = vmatprep.mubr.msk.f32.mxu1 %vm3016_vm0, %v4280_v40  ;;  %v2607_v12 = vpack.c.bf16 %v1294_v36, %v1287_v25  ;;  %v2622_v25 = vpack.c.bf16 %v4306_v2, %v4305_v1  ;;  %v2625_v36 = vpack.c.bf16 %v4308_v20, %v4307_v19 }
 0x25d   : > { %2537 = vmatprep.subr.bf16.mxu1 %v3015_v9 }
 0x260   : > { %2539 = vmatpush3.bf16.msra.mxu1 %v3890_v13  ;;  %v2610_v13 = vpack.c.bf16 %v1308_v14, %v1301_v33  ;;  %v2628_v33 = vpack.c.bf16 %v4310_v28, %v4309_v24  ;;  %v1176_v14 = vld [vmem:[#allocation2] sm:$0xff] }
 0x261   : > { %2540 = vmatprep.subr.bf16.mxu1 %v3015_v9 }
 0x264   : > { %2542 = vmatpush3.bf16.msra.mxu1 %v2541_v47 }
 0x265   : > { %2543 = vmatprep.subr.bf16.mxu1 %v3015_v9 }
 0x268   : > { %2545 = vmatpush3.bf16.msra.mxu1 %v2544_v38 }
 0x269   : > { %2546 = vmatprep.subr.bf16.mxu1 %v3015_v9 }
 0x26c   : > { %2548 = vmatpush3.bf16.msra.mxu1 %v2547_v45 }
 0x26d   : > { %2549 = vmatprep.subr.bf16.mxu1 %v3015_v9 }
 0x270   : > { %2551 = vmatpush3.bf16.msra.mxu1 %v2550_v32 }
 0x271   : > { %2552 = vmatprep.subr.bf16.mxu1 %v3015_v9 }
 0x274   : > { %2554 = vmatpush3.bf16.msra.mxu1 %v2553_v7 }
 0x275   : > { %2555 = vmatprep.subr.bf16.mxu1 %v3015_v9 }
 0x278   : > { %2557 = vmatpush3.bf16.msra.mxu1 %v2556_v42 }
 0x279   : > { %2558 = vmatprep.subr.bf16.mxu1 %v3015_v9 }
 0x27b   : > { %2176 = vmatmul.mubr.f32.vlgmr.msra.gmra.mrb[2].mxu1 %v3948_v46 }
 0x27c   : > { %2560 = vmatpush3.bf16.msra.mxu1 %v2559_v51  ;;  %2210 = vmatprep.mubr.msk.f32.mxu1 %vm3016_vm0, %v4280_v40 }
 0x27d   : > { %2561 = vmatprep.subr.bf16.mxu1 %v3015_v9 }
 0x280   : > { %2563 = vmatpush3.bf16.msra.mxu1 %v2562_v52 }
 0x281   : > { %2564 = vmatprep.subr.bf16.mxu1 %v3015_v9 }
 0x284   : > { %2566 = vmatpush3.bf16.msra.mxu1 %v2565_v3 }
 0x285   : > { %2567 = vmatprep.subr.bf16.mxu1 %v3015_v9 }
 0x288   : > { %2569 = vmatpush3.bf16.msra.mxu1 %v2568_v55 }
 0x289   : > { %2570 = vmatprep.subr.bf16.mxu1 %v3015_v9 }
 0x28c   : > { %2572 = vmatpush3.bf16.msra.mxu1 %v2571_v27 }
 0x28d   : > { %2573 = vmatprep.subr.bf16.mxu1 %v3015_v9 }
 0x290   : > { %2575 = vmatpush3.bf16.msra.mxu1 %v2574_v26 }
 0x291   : > { %2576 = vmatprep.subr.bf16.mxu1 %v3015_v9 }
 0x294   : > { %2578 = vmatpush3.bf16.msra.mxu1 %v2577_v15 }
 0x295   : > { %2579 = vmatprep.subr.bf16.mxu1 %v3015_v9 }
 0x298   : > { %2581 = vmatpush3.bf16.msra.mxu1 %v2580_v57 }
 0x299   : > { %2582 = vmatprep.subr.bf16.mxu1 %v3015_v9 }
 0x29b   : > { %2211 = vmatmul.mubr.f32.vlgmr.msra.gmra.mrb[4].mxu1 %v1275_v22 }
 0x29c   : > { %2584 = vmatpush3.bf16.msra.mxu1 %v3783_v0  ;;  %2245 = vmatprep.mubr.msk.f32.mxu1 %vm3016_vm0, %v4280_v40 }
 0x29d   : > { %2585 = vmatprep.subr.bf16.mxu1 %v3015_v9 }
 0x2a0   : > { %2587 = vmatpush3.bf16.msra.mxu1 %v3790_v49 }
 0x2a1   : > { %2588 = vmatprep.subr.bf16.mxu1 %v3015_v9 }
 0x2a4   : > { %2590 = vmatpush3.bf16.msra.mxu1 %v3796_v4 }
 0x2a5   : > { %2591 = vmatprep.subr.bf16.mxu1 %v3015_v9 }
 0x2a8   : > { %2593 = vmatpush3.bf16.msra.mxu1 %v3802_v23 }
 0x2a9   : > { %2594 = vmatprep.subr.bf16.mxu1 %v3015_v9 }
 0x2ac   : > { %2596 = vmatpush3.bf16.msra.mxu1 %v3808_v62 }
 0x2ad   : > { %2597 = vmatprep.subr.bf16.mxu1 %v3015_v9 }
 0x2b0   : > { %2599 = vmatpush3.bf16.msra.mxu1 %v3814_v39 }
 0x2b1   : > { %2600 = vmatprep.subr.bf16.mxu1 %v3015_v9 }
 0x2b4   : > { %2602 = vmatpush3.bf16.msra.mxu1 %v3824_v59 }
 0x2b5   : > { %2603 = vmatprep.subr.bf16.mxu1 %v3015_v9 }
 0x2b8   : > { %2605 = vmatpush3.bf16.msra.mxu1 %v3858_v10 }
 0x2b9   : > { %2606 = vmatprep.subr.bf16.mxu1 %v3015_v9 }
 0x2bb   : > { %2246 = vmatmul.mubr.f32.vlgmr.msra.gmra.mrb[6].mxu1 %v1276_v18 }
 0x2bc   : > { %2608 = vmatpush3.bf16.msra.mxu1 %v2607_v12  ;;  %2280 = vmatprep.mubr.msk.f32.mxu1 %vm3016_vm0, %v4280_v40 }
 0x2bd   : > { %2609 = vmatprep.subr.bf16.mxu1 %v3015_v9 }
 0x2c0   : > { %2611 = vmatpush3.bf16.msra.mxu1 %v2610_v13 }
 0x2c1   : > { %2612 = vmatprep.subr.bf16.mxu1 %v3015_v9 }
 0x2c4   : > { %2614 = vmatpush3.bf16.msra.mxu1 %v2613_v53 }
 0x2c5   : > { %2615 = vmatprep.subr.bf16.mxu1 %v3015_v9 }
 0x2c8   : > { %2617 = vmatpush3.bf16.msra.mxu1 %v2616_v58 }
 0x2c9   : > { %2618 = vmatprep.subr.bf16.mxu1 %v3015_v9 }
 0x2cc   : > { %2620 = vmatpush3.bf16.msra.mxu1 %v2619_v61 }
 0x2cd   : > { %2621 = vmatprep.subr.bf16.mxu1 %v3015_v9 }
 0x2d0   : > { %2623 = vmatpush3.bf16.msra.mxu1 %v2622_v25 }
 0x2d1   : > { %2624 = vmatprep.subr.bf16.mxu1 %v3015_v9 }
 0x2d4   : > { %2626 = vmatpush3.bf16.msra.mxu1 %v2625_v36 }
 0x2d5   : > { %2627 = vmatprep.subr.bf16.mxu1 %v3015_v9 }
 0x2d8   : > { %2629 = vmatpush3.bf16.msra.mxu1 %v2628_v33 }
 0x2d9   : > { %2630 = vmatprep.subr.bf16.mxu1 %v3015_v9 }
 0x2db   : > { %2281 = vmatmul.mubr.f32.vlgmr.msra.gmra.mrb[8].mxu1 %v3948_v46 }
 0x2dc   : > { %2632 = vmatpush3.bf16.msra.mxu1 %v3783_v0  ;;  %2315 = vmatprep.mubr.msk.f32.mxu1 %vm3016_vm0, %v4280_v40 }
 0x2dd   : > { %2633 = vmatprep.subr.bf16.mxu1 %v3015_v9 }
 0x2e0   : > { %2635 = vmatpush3.bf16.msra.mxu1 %v3790_v49 }
 0x2e1   : > { %2636 = vmatprep.subr.bf16.mxu1 %v3015_v9 }
 0x2e4   : > { %2638 = vmatpush3.bf16.msra.mxu1 %v3796_v4 }
 0x2e5   : > { %2639 = vmatprep.subr.bf16.mxu1 %v3015_v9 }
 0x2e8   : > { %2641 = vmatpush3.bf16.msra.mxu1 %v3802_v23 }
 0x2e9   : > { %2642 = vmatprep.subr.bf16.mxu1 %v3015_v9 }
 0x2ec   : > { %2644 = vmatpush3.bf16.msra.mxu1 %v3808_v62 }
 0x2ed   : > { %2645 = vmatprep.subr.bf16.mxu1 %v3015_v9 }
 0x2f0   : > { %2647 = vmatpush3.bf16.msra.mxu1 %v3814_v39 }
 0x2f1   : > { %2648 = vmatprep.subr.bf16.mxu1 %v3015_v9 }
 0x2f4   : > { %2650 = vmatpush3.bf16.msra.mxu1 %v3824_v59 }
 0x2f5   : > { %2651 = vmatprep.subr.bf16.mxu1 %v3015_v9 }
 0x2f8   : > { %2653 = vmatpush3.bf16.msra.mxu1 %v3858_v10 }
 0x2fb   : > { %2316 = vmatmul.mubr.f32.vlgmr.msra.gmra.mrb[10].mxu1 %v3948_v46 }
 0x32e   : > { %v1280_v40 = vpop.f32.mrb[0].mxu1 }
 0x32f   : > { %v2142_v0 = vpop.f32.mrb[1].mxu1 }
 0x34e   : > { %v1431_v49 = vpop.f32.mrb[2].mxu1 }
 0x34f   : > { %v1432_v4 = vadd.f32 %v1431_v49, %v1280_v40  ;;  %v2177_v23 = vpop.f32.mrb[3].mxu1 }
 0x36e   : > { %v1535_v62 = vpop.f32.mrb[4].mxu1 }
 0x36f   : > { %v1536_v30 = vadd.f32 %v1535_v62, %v1432_v4  ;;  %v2212_v31 = vpop.f32.mrb[5].mxu1 }
 0x38e   : > { %v1624_v34 = vpop.f32.mrb[6].mxu1 }
 0x38f   : > { %v1625_v39 = vadd.f32 %v1624_v34, %v1536_v30  ;;  %v2247_v35 = vpop.f32.mrb[7].mxu1 }
 0x3ae   : > { %v1743_v8 = vpop.f32.mrb[8].mxu1 }
 0x3af   : > { %v1744_v48 = vadd.f32 %v1743_v8, %v1625_v39  ;;  %v2282_v59 = vpop.f32.mrb[9].mxu1 }
 0x3cd   : > { %1839 = sbr.rel (%p1999_p7) target bundleno = 988 (0x3dc), region = 52 }
 0x3ce   : > { %v1830_v9 = vpop.f32.mrb[10].mxu1 }
 0x3cf   : > { %v1831_v50 = vadd.f32 %v1830_v9, %v1744_v48  ;;  %v2317_v10 = vpop.f32.mrb[11].mxu1 }
 0x3d1   : > { %v1834_v44 = vadd.f32 %v1831_v50, %v1176_v14 }
 0x3d3   : > { %1835 = vst [vmem:[#allocation2] sm:$0xff] %v1834_v44 }
 0x3da   : > { %v1840_v17 = vld [vmem:[#allocation2] sm:$0xff] }
 0x3db   : > { %1841 = vst [vmem:[%s3328_s12] sm:$0xff] %v1840_v17 }
 0x3dc PF: > { %s4311_s25 = sld [smem:[#allocation15_spill]]  ;;  %s1856_s8 = sshll.u32 %s3328_s12, 4  ;;  %s1857_s8 = int_to_ptr.vmem [resolvable:$true] %s1856_s8 }
 0x3dd   : > { %s4312_s5 = sld [smem:[#allocation44_spill]]  ;;  %s1843_s14 = scalar_lea.sflag [#allocation5], %s3308_s28 }
 0x3de   : > { %s2878_s17 = scalar_lea.vmem %s1857_s8, 128  ;;  %p4313_p10 = scmp.ne.s32.totalorder %s4216_s23, 0 }
 0x3df   : > { %p2879_p2 = scmp.ne.s32.totalorder %s1857_s8, %s2878_s17  ;;  %s3017_s18 = smov [#allocation9]  }
 0x3e0   : > { %s2882_s26 = sshll.u32 %s3017_s18, 4  ;;  %s2883_s26 = int_to_ptr.vmem [resolvable:$false] %s2882_s26 }
 0x3e1   : > { %p2880_p13 = pnand %p2879_p2, %p4313_p10  ;;  %s2884_s4 = scalar_lea.vmem %s2883_s26, 256 }
 0x3e2   : > { %s2001_s11 = sshll.u32 %s4311_s25, 7  ;;  %p2885_p9 = scmp.lt.s32.totalorder %s1857_s8, %s2883_s26 }
 0x3e3   : > { %s4059_s10 = scalar_lea.hbm %s4312_s5, %s2001_s11  ;;  %p2881_p8 = pneg %p2880_p13 }
 0x3e4   : > { %p2886_p11 = scmp.lt.s32.totalorder %s2884_s4, %s2878_s17 }
 0x3e6   : > { %p2887_p4 = por %p2886_p11, %p2885_p9 }
 0x3e8   : > { %p2888_p1 = pnand %p2887_p4, %p2881_p8 }
 0x3ea   : > { %2891 = shalt.err (!%p2888_p1)
}
 0x3eb   : > { %s2892_s28 = scalar_lea.hbm %s4059_s10, 128  ;;  %s2896_s9 = scalar_lea.hbm %s4312_s5, 256 }
 0x3ec   : > { %p2893_p3 = scmp.ne.s32.totalorder %s4059_s10, %s2892_s28  ;;  %p2897_p5 = scmp.lt.u32.totalorder %s4059_s10, %s4312_s5 }
 0x3ed   : > { %p2898_p12 = scmp.lt.u32.totalorder %s2896_s9, %s2892_s28  ;;  %p2900_p2 = scmp.lt.u32.totalorder %s2892_s28, %s4059_s10 }
 0x3ee   : > { %p2894_p6 = pnand %p2893_p3, %p4313_p10 }
 0x3ef   : > { %p2899_p7 = por %p2898_p12, %p2897_p5 }
 0x3f0   : > { %p2895_p0 = pneg %p2894_p6 }
 0x3f1   : > { %p2901_p13 = por %p2900_p2, %p2899_p7 }
 0x3f3   : > { %p2902_p8 = pnand %p2901_p13, %p2895_p0 }
 0x3f5   : > { %2905 = shalt.err (!%p2902_p8)
}
 0x3f6   : > { %2670 = dma.vmem_to_hbm [thread:$0]  (%p4313_p10), %s1857_s8, 128, %s4059_s10, %s1843_s14  }
 0x3f7 PF: > { %p2687_p9 = scmp.ge.s32.totalorder %s3004_s22, 2  ;;  %s1868_s19 = sand.u32 1, %s2976_s15  }
 0x3f8   : > { %p4314_p11 = scmp.ne.s32.totalorder %s4217_s6, 0  ;;  %s1869_s24 = scalar_lea.sflag [#allocation5], %s1868_s19 }
 0x3fa   : > { %p2683_p4 = pnand %p2687_p9, %p4314_p11 }
 0x3fc   : > { %2959 = dma.done.wait (!%p2683_p4), %s1869_s24, 128  }
 0x3fd   : > { %2961 = vsyncadd (!%p2683_p4), %s1869_s24, 4294967168  ;;  %s22_s22 = sadd.s32 1, %s3004_s22   ;;  %s4315_s3 = sld [smem:[#allocation13_spill]] }
 0x3fe   : > { %p19_p1 = scmp.ge.s32.totalorder %s22_s22, 6   ;;  %s4316_s14 = sld [smem:[#allocation19_spill]] }
 0x3ff   : > { %s4317_s23 = sld [smem:[#allocation14_spill]]  ;;  %s4318_s17 = sld [smem:[#allocation20_spill]] }
 0x400   : > { %s4319_s19 = sld [smem:[#allocation16_spill]]  ;;  %s4320_s25 = sld [smem:[#allocation17_spill]] }
 0x401   : > { %s4321_s21 = sld [smem:[#allocation18_spill]]  ;;  %s4322_s12 = smov %s2968_s13 }
 0x402   : > { %s4324_s15 = smov %s2980_s16  ;;  %s4326_s18 = smov %s2996_s20 }
 0x403   : > { %s4323_s13 = smov %s4315_s3  ;;  %21 = sbr.rel (!%p19_p1) target bundleno = 14 (0xe), region = 109 }
 0x405   : > { %s4325_s16 = smov %s4317_s23 }
 0x406   : > { %s4327_s20 = smov %s4320_s25 }
 0x40a   :  { %1874 = vsyncpa [#allocation4], 1 }
 0x40b   :  { %1876 = vsyncpa [#allocation4 + $0x1], 1 }
 0x40c   :  { %1877 = vsyncpa [#allocation7], 1 }
 0x40d   :  { %1879 = vsyncpa [#allocation7 + $0x1], 1 }
 0x40e   :  { %1880 = vsyncpa [#allocation5], 1 }
 0x40f   :  { %1882 = vsyncpa [#allocation5 + $0x1], 1 }

</bundles_post_ra>
